<compile_context>
chip_gen: v6e
topology: v6e:2x2x1
jax: 0.10.0
libtpu: 0.0.40
codegen_flags: <defaults>
</compile_context>

<pallas_src>
import functools

import jax
import jax.numpy as jnp
from jax.experimental import pallas as pl
from jax.experimental.pallas import tpu as pltpu

LANE = 128


def _round_up(x, m):
    return (x + m - 1) // m * m


def _apply_act(z, act):
    if act == "relu":
        return jnp.maximum(z, 0.0)
    if act == "elu":
        return jnp.where(z > 0.0, z, jnp.expm1(z))
    return z  # None -> identity


# ----------------------------------------------------------------------------
# Pallas kernels
# ----------------------------------------------------------------------------
def _transform_kernel(x_ref, w_ref, o_ref):
    # H_tile = X_tile @ W   (layer-1 feature transform, row-tiled)
    o_ref[...] = jnp.dot(
        x_ref[...], w_ref[...], preferred_element_type=jnp.float32
    ).astype(o_ref.dtype)


def _agg_kernel(a_ref, h_ref, b_ref, *rest, act, fused_w):
    # K-tiled aggregation:
    #   acc += A[i, k] @ H[k]            (f32 accumulate on MXU)
    #   at k == last:  z = act(acc + b) [ @ W_next ]  -> store
    if fused_w:
        w_ref, o_ref, acc_ref = rest
    else:
        o_ref, acc_ref = rest
        w_ref = None

    k = pl.program_id(1)

    @pl.when(k == 0)
    def _():
        acc_ref[...] = jnp.zeros_like(acc_ref)

    # A may be stored as int8 (dequant scale folded into the weights); cast to
    # bf16 (exact for |q| <= 127) so the MXU always sees bf16 x bf16.
    a = a_ref[...].astype(jnp.bfloat16)
    acc_ref[...] += jnp.dot(a, h_ref[...], preferred_element_type=jnp.float32)

    @pl.when(k == pl.num_programs(1) - 1)
    def _():
        z = acc_ref[...] + b_ref[...]          # bias (f32 epilogue)
        z = _apply_act(z, act)
        if fused_w:
            # Fused next-layer feature transform on the same row tile.
            o_ref[...] = jnp.dot(
                z.astype(w_ref.dtype), w_ref[...],
                preferred_element_type=jnp.float32,
            ).astype(o_ref.dtype)
        else:
            o_ref[...] = z.astype(o_ref.dtype)


# ----------------------------------------------------------------------------
# Pallas wrappers
# ----------------------------------------------------------------------------
def transform_pallas(x, w, tm):
    n_pad, c_in_pad = x.shape
    c_out_pad = w.shape[1]

    vmem_needed = (
        2 * tm * c_in_pad * x.dtype.itemsize          # X row tile, double-buffered
        + 2 * c_in_pad * c_out_pad * w.dtype.itemsize  # W (fetched once)
        + 2 * tm * c_out_pad * 2                       # bf16 output tile
    )
    cost = pl.CostEstimate(
        flops=2 * n_pad * c_in_pad * c_out_pad,
        transcendentals=0,
        bytes_accessed=x.size * x.dtype.itemsize
        + w.size * w.dtype.itemsize
        + n_pad * c_out_pad * 2,
    )
    return pl.pallas_call(
        _transform_kernel,
        out_shape=jax.ShapeDtypeStruct((n_pad, c_out_pad), jnp.bfloat16),
        grid=(n_pad // tm,),
        in_specs=[
            pl.BlockSpec((tm, c_in_pad), lambda i: (i, 0)),
            pl.BlockSpec((c_in_pad, c_out_pad), lambda i: (0, 0)),
        ],
        out_specs=pl.BlockSpec((tm, c_out_pad), lambda i: (i, 0)),
        compiler_params=pltpu.CompilerParams(
            dimension_semantics=("parallel",),
            vmem_limit_bytes=max(vmem_needed + (8 << 20), 32 << 20),
        ),
        cost_estimate=cost,
    )(x, w)


def aggregate_pallas(a, h, b, w_next, act, tm, tk):
    """out = act(A @ H + b) [@ W_next], K-tiled over source nodes."""
    n_pad = a.shape[0]
    c_pad = h.shape[1]
    grid = (n_pad // tm, n_pad // tk)

    in_specs = [
        pl.BlockSpec((tm, tk), lambda i, k: (i, k)),      # A tile (int8/bf16 stream)
        pl.BlockSpec((tk, c_pad), lambda i, k: (k, 0)),   # H K-slab
        pl.BlockSpec((1, c_pad), lambda i, k: (0, 0)),    # bias (f32, fetched once)
    ]
    operands = [a, h, b]

    fused = w_next is not None
    if fused:
        c_next = w_next.shape[1]
        in_specs.append(pl.BlockSpec((c_pad, c_next), lambda i, k: (0, 0)))
        operands.append(w_next)
        out_dtype = jnp.bfloat16
        w_bytes = w_next.size * w_next.dtype.itemsize
        extra_flops = 2 * n_pad * c_pad * c_next
    else:
        c_next = c_pad
        out_dtype = jnp.float32
        w_bytes = 0
        extra_flops = 0

    out_itemsize = jnp.dtype(out_dtype).itemsize
    vmem_needed = (
        2 * tm * tk * a.dtype.itemsize        # A, double-buffered
        + 2 * tk * c_pad * h.dtype.itemsize   # H slab, double-buffered
        + 2 * 1 * c_pad * 4                   # bias
        + 2 * c_pad * c_next * 2              # W_next (over-counts final layer; fine)
        + tm * c_pad * 4                      # f32 accumulator scratch
        + 2 * tm * c_next * out_itemsize      # output tile
    )
    cost = pl.CostEstimate(
        flops=2 * n_pad * n_pad * c_pad + extra_flops,
        transcendentals=0,
        bytes_accessed=a.size * a.dtype.itemsize
        + (n_pad // tm) * h.size * h.dtype.itemsize   # H re-streamed per row tile
        + w_bytes
        + n_pad * c_next * out_itemsize,
    )

    return pl.pallas_call(
        functools.partial(_agg_kernel, act=act, fused_w=fused),
        out_shape=jax.ShapeDtypeStruct((n_pad, c_next), out_dtype),
        grid=grid,
        in_specs=in_specs,
        out_specs=pl.BlockSpec((tm, c_next), lambda i, k: (i, 0)),
        scratch_shapes=[pltpu.VMEM((tm, c_pad), jnp.float32)],
        compiler_params=pltpu.CompilerParams(
            dimension_semantics=("parallel", "arbitrary"),
            vmem_limit_bytes=max(vmem_needed + (8 << 20), 32 << 20),
        ),
        cost_estimate=cost,
    )(*operands)


# ----------------------------------------------------------------------------
# Glue: symmetric GCN normalization (add_remaining_self_loops), densified [N, N]
# ----------------------------------------------------------------------------
def gcn_norm_dense(edge_index, edge_weight, num_nodes, dtype=jnp.float32):
    row, col = edge_index[0], edge_index[1]
    if edge_weight is None:
        edge_weight = jnp.ones((row.shape[0],), dtype=dtype)
    w = edge_weight.astype(dtype)

    # add_remaining_self_loops: weight-1 loops only for nodes without one already.
    has_loop = (
        jnp.zeros((num_nodes,), jnp.int32).at[row].max((row == col).astype(jnp.int32))
    )
    loop = jnp.arange(num_nodes, dtype=row.dtype)
    loop_w = jnp.where(has_loop > 0, 0.0, 1.0).astype(dtype)

    row_all = jnp.concatenate([row, loop])
    col_all = jnp.concatenate([col, loop])
    w_all = jnp.concatenate([w, loop_w])

    deg = jnp.zeros((num_nodes,), dtype=dtype).at[col_all].add(w_all)
    deg_inv_sqrt = jnp.where(deg > 0, jax.lax.rsqrt(jnp.maximum(deg, 1e-12)), 0.0)
    norm = deg_inv_sqrt[row_all] * w_all * deg_inv_sqrt[col_all]

    # out[target] = sum_e norm_e * x[source]  =>  A[target, source] = norm
    a = jnp.zeros((num_nodes, num_nodes), dtype=dtype).at[col_all, row_all].add(norm)
    return a


# ----------------------------------------------------------------------------
# GCN model: hids=[16], acts=['relu'], bias=True, bn=False, normalize=True
# ----------------------------------------------------------------------------
def init_gcn_params(key, in_channels, out_channels, hids=(16,)):
    """Glorot-uniform weights, zero bias, matching GCNConv layer shapes."""
    params = []
    dims = [in_channels] + list(hids) + [out_channels]
    for i in range(len(dims) - 1):
        c_in, c_out = dims[i], dims[i + 1]
        key, wk = jax.random.split(key)
        limit = jnp.sqrt(6.0 / (c_in + c_out))
        w = jax.random.uniform(wk, (c_in, c_out), jnp.float32, -limit, limit)
        b = jnp.zeros((c_out,), jnp.float32)
        params.append((w, b))
    return params


def _select_tiles(n):
    # VMEM is O(tm*tk); tiles sized so per-step A DMA is >= ~0.5-2 MiB while
    # staying far under the 16/32 MiB scoped defaults (v5e / v6e+v7x).
    if n <= 512:
        return 256, 256
    if n <= 2048:
        return 256, 512
    if n <= 8192:
        return 256, 1024
    return 512, 2048


def gcn_forward(params, x, edge_index, edge_weight=None, acts=("relu",),
                quantize_adj=True):
    n, c_in = x.shape
    # NOTE: dense O(N^2) adjacency is the scalability ceiling; see block-sparse TODO.
    a = gcn_norm_dense(edge_index, edge_weight, n, dtype=jnp.float32)

    tm, tk = _select_tiles(n)
    n_pad = _round_up(n, max(tm, tk))   # multiple of 256: lane-dense, full MXU K pass

    # --- adjacency storage: int8 (bandwidth win; A stream is the bottleneck) ---
    if quantize_adj:
        a_scale = jnp.maximum(jnp.max(jnp.abs(a)), 1e-12) / 127.0
        a_q = jnp.clip(jnp.round(a / a_scale), -127.0, 127.0).astype(jnp.int8)
        a_pad = jnp.zeros((n_pad, n_pad), jnp.int8).at[:n, :n].set(a_q)
    else:
        a_scale = None
        a_pad = jnp.zeros((n_pad, n_pad), jnp.bfloat16).at[:n, :n].set(
            a.astype(jnp.bfloat16)
        )

    c_in_pad = _round_up(c_in, LANE)
    x_pad = jnp.zeros((n_pad, c_in_pad), jnp.bfloat16).at[:n, :c_in].set(
        x.astype(jnp.bfloat16)
    )

    # Pad weights/biases to lane-dense shapes; fold the A dequant scale into
    # every W (A ~ s*A_q  =>  A @ (H W_l) == A_q @ (H (s*W_l))).
    w_pads, b_pads = [], []
    for (w, b) in params:
        ci, co = w.shape
        ci_p, co_p = _round_up(ci, LANE), _round_up(co, LANE)
        w_eff = w if a_scale is None else w * a_scale
        w_pads.append(
            jnp.zeros((ci_p, co_p), jnp.bfloat16).at[:ci, :co].set(
                w_eff.astype(jnp.bfloat16)
            )
        )
        b_pads.append(
            jnp.zeros((1, co_p), jnp.float32).at[0, :co].set(b.astype(jnp.float32))
        )

    num_layers = len(params)

    # Layer-1 feature transform (hoisted out of the aggregation loop).
    h = transform_pallas(x_pad, w_pads[0], tm)

    # Hidden layers: K-tiled aggregation + bias + act, fused with next transform.
    for li in range(num_layers - 1):
        act = acts[li] if li < len(acts) else "relu"
        h = aggregate_pallas(a_pad, h, b_pads[li], w_pads[li + 1], act, tm, tk)
        # Dropout(p=0.5) / BatchNorm1d: identity in eval mode.

    # Final layer: aggregate + bias, no activation, f32 lane-dense output.
    out_pad = aggregate_pallas(a_pad, h, b_pads[-1], None, None, tm, tk)

    c_out = params[-1][0].shape[1]
    return out_pad[:n, :c_out]


# ----------------------------------------------------------------------------
# Pure-JAX f32 reference (for validation)
# ----------------------------------------------------------------------------
def gcn_reference(params, x, edge_index, edge_weight=None, acts=("relu",)):
    n = x.shape[0]
    a = gcn_norm_dense(edge_index, edge_weight, n, dtype=jnp.float32)
    h = x.astype(jnp.float32)
    num_layers = len(params)
    for li, (w, b) in enumerate(params):
        h = a @ (h @ w) + b[None, :]
        if li < num_layers - 1:
            h = _apply_act(h, acts[li] if li < len(acts) else "relu")
    return h


if __name__ == "__main__":
    key = jax.random.PRNGKey(0)

    # Small synthetic graph: 128 nodes, 32 input features, 512 edges.
    N, IN_CHANNELS, OUT_CHANNELS, NUM_EDGES = 128, 32, 8, 512
    key, kx, ke, kp = jax.random.split(key, 4)
    x = jax.random.normal(kx, (N, IN_CHANNELS), dtype=jnp.float32)
    edge_index = jax.random.randint(ke, (2, NUM_EDGES), 0, N, dtype=jnp.int32)

    fwd = jax.jit(gcn_forward, static_argnames=("acts", "quantize_adj"))

    # Config 1: default GCN(32, 8) — hids=[16], acts=['relu'], int8-quantized A.
    params1 = init_gcn_params(kp, IN_CHANNELS, OUT_CHANNELS, hids=(16,))
    out1 = fwd(params1, x, edge_index, acts=("relu",), quantize_adj=True)
    jax.block_until_ready(out1)
    assert out1.shape == (N, OUT_CHANNELS), out1.shape
    assert bool(jnp.all(jnp.isfinite(out1)))
    ref1 = gcn_reference(params1, x, edge_index, acts=("relu",))
    err1 = float(jnp.max(jnp.abs(out1 - ref1)) / (jnp.max(jnp.abs(ref1)) + 1e-6))
    assert err1 < 0.25, f"int8-A path error too large: {err1}"

    # Config 2: two hidden layers (relu, elu), bf16 adjacency (no quantization).
    key, kp2 = jax.random.split(key)
    params2 = init_gcn_params(kp2, IN_CHANNELS, OUT_CHANNELS, hids=(32, 16))
    out2 = fwd(params2, x, edge_index, acts=("relu", "elu"), quantize_adj=False)
    jax.block_until_ready(out2)
    assert out2.shape == (N, OUT_CHANNELS), out2.shape
    assert bool(jnp.all(jnp.isfinite(out2)))
    ref2 = gcn_reference(params2, x, edge_index, acts=("relu", "elu"))
    err2 = float(jnp.max(jnp.abs(out2 - ref2)) / (jnp.max(jnp.abs(ref2)) + 1e-6))
    assert err2 < 0.15, f"bf16-A path error too large: {err2}"

    print("KERNEL_OK")
</pallas_src>

<mosaic_0001>
module attributes {stable_mosaic.version = 11 : i64} {
  func.func private @main(%arg0: i32) attributes {dimension_semantics = [#tpu.dimension_semantics<core_parallel>], iteration_bounds = array<i64: 2>, tpu.core_type = #tpu.core_type<sc_scalar_subcore>, window_params = []} {
    return
  }
}

module attributes {stable_mosaic.version = 11 : i64} {
  func.func private @main(%arg0: i32) attributes {dimension_semantics = [#tpu.dimension_semantics<core_parallel>], iteration_bounds = array<i64: 2>, tpu.core_type = #tpu.core_type<sc_scalar_subcore>, window_params = []} {
    return
  }
}

module attributes {stable_mosaic.version = 11 : i64} {
  func.func @_transform_kernel(%arg0: i32, %arg1: memref<256x128xbf16, #tpu.memory_space<vmem>>, %arg2: memref<128x128xbf16, #tpu.memory_space<vmem>>, %arg3: memref<256x128xbf16, #tpu.memory_space<vmem>>) attributes {dimension_semantics = [#tpu.dimension_semantics<parallel>], iteration_bounds = array<i64: 1>, scalar_prefetch = 0 : i64, scratch_operands = 0 : i64, tpu.core_type = #tpu.core_type<tc>, window_params = [{transform_indices = @transform_0, window_bounds = array<i64: 256, 128>}, {pipeline_mode = #tpu.pipeline_mode<synchronous>, transform_indices = @transform_1, window_bounds = array<i64: 128, 128>}, {transform_indices = @transform_2, window_bounds = array<i64: 256, 128>}]} {
    %c0 = arith.constant 0 : index
    %c0_0 = arith.constant 0 : index
    %0 = vector.load %arg1[%c0, %c0_0] : memref<256x128xbf16, #tpu.memory_space<vmem>>, vector<256x128xbf16>
    %c0_1 = arith.constant 0 : index
    %c0_2 = arith.constant 0 : index
    %1 = vector.load %arg2[%c0_1, %c0_2] : memref<128x128xbf16, #tpu.memory_space<vmem>>, vector<128x128xbf16>
    %cst = arith.constant dense<0.000000e+00> : vector<256x128xf32>
    %2 = tpu.matmul %0, %1, %cst {dimension_numbers = #tpu.dot_dimension_numbers<[1], [0], [0], [1], [0, 0, 1, 1], [], []>} : vector<256x128xbf16>, vector<128x128xbf16>, vector<256x128xf32> -> vector<256x128xf32>
    %3 = arith.truncf %2 : vector<256x128xf32> to vector<256x128xbf16>
    %c0_3 = arith.constant 0 : index
    %c0_4 = arith.constant 0 : index
    %4 = vector.load %arg3[%c0_3, %c0_4] : memref<256x128xbf16, #tpu.memory_space<vmem>>, vector<256x128xbf16>
    tpu.vector_store %arg3[%c0_3, %c0_4], %3 {strides = array<i32>} : memref<256x128xbf16, #tpu.memory_space<vmem>>, vector<256x128xbf16>,
    return
  }
  func.func @transform_0(%arg0: i32) -> (i32, i32) {
    %c0_i32 = arith.constant 0 : i32
    %c0_i32_0 = arith.constant 0 : i32
    return %arg0, %c0_i32 : i32, i32
  }
  func.func @transform_1(%arg0: i32) -> (i32, i32) {
    %c0_i32 = arith.constant 0 : i32
    %c0_i32_0 = arith.constant 0 : i32
    %c0_i32_1 = arith.constant 0 : i32
    return %c0_i32, %c0_i32_0 : i32, i32
  }
  func.func @transform_2(%arg0: i32) -> (i32, i32) {
    %c0_i32 = arith.constant 0 : i32
    %c0_i32_0 = arith.constant 0 : i32
    return %arg0, %c0_i32 : i32, i32
  }
}

module attributes {stable_mosaic.version = 11 : i64} {
  func.func @_agg_kernel(%arg0: i32, %arg1: i32, %arg2: memref<256x256xi8, #tpu.memory_space<vmem>>, %arg3: memref<256x128xbf16, #tpu.memory_space<vmem>>, %arg4: memref<1x128xf32, #tpu.memory_space<vmem>>, %arg5: memref<128x128xbf16, #tpu.memory_space<vmem>>, %arg6: memref<256x128xbf16, #tpu.memory_space<vmem>>, %arg7: memref<256x128xf32, #tpu.memory_space<vmem>>) attributes {dimension_semantics = [#tpu.dimension_semantics<parallel>, #tpu.dimension_semantics<arbitrary>], iteration_bounds = array<i64: 1, 1>, scalar_prefetch = 0 : i64, scratch_operands = 1 : i64, tpu.core_type = #tpu.core_type<tc>, window_params = [{transform_indices = @transform_0, window_bounds = array<i64: 256, 256>}, {transform_indices = @transform_1, window_bounds = array<i64: 256, 128>}, {pipeline_mode = #tpu.pipeline_mode<synchronous>, transform_indices = @transform_2, window_bounds = array<i64: 1, 128>}, {pipeline_mode = #tpu.pipeline_mode<synchronous>, transform_indices = @transform_3, window_bounds = array<i64: 128, 128>}, {transform_indices = @transform_4, window_bounds = array<i64: 256, 128>}]} {
    %c0_i32 = arith.constant 0 : i32
    %0 = arith.cmpi eq, %arg1, %c0_i32 : i32
    %1 = arith.extui %0 : i1 to i32
    %c0_i32_0 = arith.constant 0 : i32
    %2 = arith.cmpi ne, %1, %c0_i32_0 : i32
    scf.if %2 {
      %cst_10 = arith.constant 0.000000e+00 : f32
      %13 = vector.broadcast %cst_10 : f32 to vector<256x128xf32>
      %c0_11 = arith.constant 0 : index
      %c0_12 = arith.constant 0 : index
      %14 = vector.load %arg7[%c0_11, %c0_12] : memref<256x128xf32, #tpu.memory_space<vmem>>, vector<256x128xf32>
      tpu.vector_store %arg7[%c0_11, %c0_12], %13 {strides = array<i32>} : memref<256x128xf32, #tpu.memory_space<vmem>>, vector<256x128xf32>,
    } else {
    }
    %c0 = arith.constant 0 : index
    %c0_1 = arith.constant 0 : index
    %3 = vector.load %arg2[%c0, %c0_1] : memref<256x256xi8, #tpu.memory_space<vmem>>, vector<256x256xi8>
    %4 = arith.sitofp %3 : vector<256x256xi8> to vector<256x256xbf16>
    %c0_2 = arith.constant 0 : index
    %c0_3 = arith.constant 0 : index
    %5 = vector.load %arg7[%c0_2, %c0_3] : memref<256x128xf32, #tpu.memory_space<vmem>>, vector<256x128xf32>
    %c0_4 = arith.constant 0 : index
    %c0_5 = arith.constant 0 : index
    %6 = vector.load %arg3[%c0_4, %c0_5] : memref<256x128xbf16, #tpu.memory_space<vmem>>, vector<256x128xbf16>
    %cst = arith.constant dense<0.000000e+00> : vector<256x128xf32>
    %7 = tpu.matmul %4, %6, %cst {dimension_numbers = #tpu.dot_dimension_numbers<[1], [0], [0], [1], [0, 0, 1, 1], [], []>} : vector<256x256xbf16>, vector<256x128xbf16>, vector<256x128xf32> -> vector<256x128xf32>
    %8 = arith.addf %5, %7 : vector<256x128xf32>
    %c0_6 = arith.constant 0 : index
    %c0_7 = arith.constant 0 : index
    %9 = vector.load %arg7[%c0_6, %c0_7] : memref<256x128xf32, #tpu.memory_space<vmem>>, vector<256x128xf32>
    tpu.vector_store %arg7[%c0_6, %c0_7], %8 {strides = array<i32>} : memref<256x128xf32, #tpu.memory_space<vmem>>, vector<256x128xf32>,
    %c0_i32_8 = arith.constant 0 : i32
    %10 = arith.cmpi eq, %arg1, %c0_i32_8 : i32
    %11 = arith.extui %10 : i1 to i32
    %c0_i32_9 = arith.constant 0 : i32
    %12 = arith.cmpi ne, %11, %c0_i32_9 : i32
    scf.if %12 {
      %c0_10 = arith.constant 0 : index
      %c0_11 = arith.constant 0 : index
      %13 = vector.load %arg7[%c0_10, %c0_11] : memref<256x128xf32, #tpu.memory_space<vmem>>, vector<256x128xf32>
      %c0_12 = arith.constant 0 : index
      %c0_13 = arith.constant 0 : index
      %14 = vector.load %arg4[%c0_12, %c0_13] : memref<1x128xf32, #tpu.memory_space<vmem>>, vector<1x128xf32>
      %15 = vector.broadcast %14 : vector<1x128xf32> to vector<256x128xf32>
      %16 = arith.addf %13, %15 : vector<256x128xf32>
      %cst_14 = arith.constant 0.000000e+00 : f32
      %17 = vector.broadcast %cst_14 : f32 to vector<256x128xf32>
      %18 = arith.maximumf %16, %17 : vector<256x128xf32>
      %19 = arith.truncf %18 : vector<256x128xf32> to vector<256x128xbf16>
      %c0_15 = arith.constant 0 : index
      %c0_16 = arith.constant 0 : index
      %20 = vector.load %arg5[%c0_15, %c0_16] : memref<128x128xbf16, #tpu.memory_space<vmem>>, vector<128x128xbf16>
      %cst_17 = arith.constant dense<0.000000e+00> : vector<256x128xf32>
      %21 = tpu.matmul %19, %20, %cst_17 {dimension_numbers = #tpu.dot_dimension_numbers<[1], [0], [0], [1], [0, 0, 1, 1], [], []>} : vector<256x128xbf16>, vector<128x128xbf16>, vector<256x128xf32> -> vector<256x128xf32>
      %22 = arith.truncf %21 : vector<256x128xf32> to vector<256x128xbf16>
      %c0_18 = arith.constant 0 : index
      %c0_19 = arith.constant 0 : index
      %23 = vector.load %arg6[%c0_18, %c0_19] : memref<256x128xbf16, #tpu.memory_space<vmem>>, vector<256x128xbf16>
      tpu.vector_store %arg6[%c0_18, %c0_19], %22 {strides = array<i32>} : memref<256x128xbf16, #tpu.memory_space<vmem>>, vector<256x128xbf16>,
    } else {
    }
    return
  }
  func.func @transform_0(%arg0: i32, %arg1: i32) -> (i32, i32) {
    %c0_i32 = arith.constant 0 : i32
    return %arg0, %arg1 : i32, i32
  }
  func.func @transform_1(%arg0: i32, %arg1: i32) -> (i32, i32) {
    %c0_i32 = arith.constant 0 : i32
    %c0_i32_0 = arith.constant 0 : i32
    return %arg1, %c0_i32 : i32, i32
  }
  func.func @transform_2(%arg0: i32, %arg1: i32) -> (i32, i32) {
    %c0_i32 = arith.constant 0 : i32
    %c0_i32_0 = arith.constant 0 : i32
    %c0_i32_1 = arith.constant 0 : i32
    return %c0_i32, %c0_i32_0 : i32, i32
  }
  func.func @transform_3(%arg0: i32, %arg1: i32) -> (i32, i32) {
    %c0_i32 = arith.constant 0 : i32
    %c0_i32_0 = arith.constant 0 : i32
    %c0_i32_1 = arith.constant 0 : i32
    return %c0_i32, %c0_i32_0 : i32, i32
  }
  func.func @transform_4(%arg0: i32, %arg1: i32) -> (i32, i32) {
    %c0_i32 = arith.constant 0 : i32
    %c0_i32_0 = arith.constant 0 : i32
    return %arg0, %c0_i32 : i32, i32
  }
}

module attributes {stable_mosaic.version = 11 : i64} {
  func.func @_agg_kernel(%arg0: i32, %arg1: i32, %arg2: memref<256x256xi8, #tpu.memory_space<vmem>>, %arg3: memref<256x128xbf16, #tpu.memory_space<vmem>>, %arg4: memref<1x128xf32, #tpu.memory_space<vmem>>, %arg5: memref<256x128xf32, #tpu.memory_space<vmem>>, %arg6: memref<256x128xf32, #tpu.memory_space<vmem>>) attributes {dimension_semantics = [#tpu.dimension_semantics<parallel>, #tpu.dimension_semantics<arbitrary>], iteration_bounds = array<i64: 1, 1>, scalar_prefetch = 0 : i64, scratch_operands = 1 : i64, tpu.core_type = #tpu.core_type<tc>, window_params = [{transform_indices = @transform_0, window_bounds = array<i64: 256, 256>}, {transform_indices = @transform_1, window_bounds = array<i64: 256, 128>}, {pipeline_mode = #tpu.pipeline_mode<synchronous>, transform_indices = @transform_2, window_bounds = array<i64: 1, 128>}, {transform_indices = @transform_3, window_bounds = array<i64: 256, 128>}]} {
    %c0_i32 = arith.constant 0 : i32
    %0 = arith.cmpi eq, %arg1, %c0_i32 : i32
    %1 = arith.extui %0 : i1 to i32
    %c0_i32_0 = arith.constant 0 : i32
    %2 = arith.cmpi ne, %1, %c0_i32_0 : i32
    scf.if %2 {
      %cst_10 = arith.constant 0.000000e+00 : f32
      %13 = vector.broadcast %cst_10 : f32 to vector<256x128xf32>
      %c0_11 = arith.constant 0 : index
      %c0_12 = arith.constant 0 : index
      %14 = vector.load %arg6[%c0_11, %c0_12] : memref<256x128xf32, #tpu.memory_space<vmem>>, vector<256x128xf32>
      tpu.vector_store %arg6[%c0_11, %c0_12], %13 {strides = array<i32>} : memref<256x128xf32, #tpu.memory_space<vmem>>, vector<256x128xf32>,
    } else {
    }
    %c0 = arith.constant 0 : index
    %c0_1 = arith.constant 0 : index
    %3 = vector.load %arg2[%c0, %c0_1] : memref<256x256xi8, #tpu.memory_space<vmem>>, vector<256x256xi8>
    %4 = arith.sitofp %3 : vector<256x256xi8> to vector<256x256xbf16>
    %c0_2 = arith.constant 0 : index
    %c0_3 = arith.constant 0 : index
    %5 = vector.load %arg6[%c0_2, %c0_3] : memref<256x128xf32, #tpu.memory_space<vmem>>, vector<256x128xf32>
    %c0_4 = arith.constant 0 : index
    %c0_5 = arith.constant 0 : index
    %6 = vector.load %arg3[%c0_4, %c0_5] : memref<256x128xbf16, #tpu.memory_space<vmem>>, vector<256x128xbf16>
    %cst = arith.constant dense<0.000000e+00> : vector<256x128xf32>
    %7 = tpu.matmul %4, %6, %cst {dimension_numbers = #tpu.dot_dimension_numbers<[1], [0], [0], [1], [0, 0, 1, 1], [], []>} : vector<256x256xbf16>, vector<256x128xbf16>, vector<256x128xf32> -> vector<256x128xf32>
    %8 = arith.addf %5, %7 : vector<256x128xf32>
    %c0_6 = arith.constant 0 : index
    %c0_7 = arith.constant 0 : index
    %9 = vector.load %arg6[%c0_6, %c0_7] : memref<256x128xf32, #tpu.memory_space<vmem>>, vector<256x128xf32>
    tpu.vector_store %arg6[%c0_6, %c0_7], %8 {strides = array<i32>} : memref<256x128xf32, #tpu.memory_space<vmem>>, vector<256x128xf32>,
    %c0_i32_8 = arith.constant 0 : i32
    %10 = arith.cmpi eq, %arg1, %c0_i32_8 : i32
    %11 = arith.extui %10 : i1 to i32
    %c0_i32_9 = arith.constant 0 : i32
    %12 = arith.cmpi ne, %11, %c0_i32_9 : i32
    scf.if %12 {
      %c0_10 = arith.constant 0 : index
      %c0_11 = arith.constant 0 : index
      %13 = vector.load %arg6[%c0_10, %c0_11] : memref<256x128xf32, #tpu.memory_space<vmem>>, vector<256x128xf32>
      %c0_12 = arith.constant 0 : index
      %c0_13 = arith.constant 0 : index
      %14 = vector.load %arg4[%c0_12, %c0_13] : memref<1x128xf32, #tpu.memory_space<vmem>>, vector<1x128xf32>
      %15 = vector.broadcast %14 : vector<1x128xf32> to vector<256x128xf32>
      %16 = arith.addf %13, %15 : vector<256x128xf32>
      %c0_14 = arith.constant 0 : index
      %c0_15 = arith.constant 0 : index
      %17 = vector.load %arg5[%c0_14, %c0_15] : memref<256x128xf32, #tpu.memory_space<vmem>>, vector<256x128xf32>
      tpu.vector_store %arg5[%c0_14, %c0_15], %16 {strides = array<i32>} : memref<256x128xf32, #tpu.memory_space<vmem>>, vector<256x128xf32>,
    } else {
    }
    return
  }
  func.func @transform_0(%arg0: i32, %arg1: i32) -> (i32, i32) {
    %c0_i32 = arith.constant 0 : i32
    return %arg0, %arg1 : i32, i32
  }
  func.func @transform_1(%arg0: i32, %arg1: i32) -> (i32, i32) {
    %c0_i32 = arith.constant 0 : i32
    %c0_i32_0 = arith.constant 0 : i32
    return %arg1, %c0_i32 : i32, i32
  }
  func.func @transform_2(%arg0: i32, %arg1: i32) -> (i32, i32) {
    %c0_i32 = arith.constant 0 : i32
    %c0_i32_0 = arith.constant 0 : i32
    %c0_i32_1 = arith.constant 0 : i32
    return %c0_i32, %c0_i32_0 : i32, i32
  }
  func.func @transform_3(%arg0: i32, %arg1: i32) -> (i32, i32) {
    %c0_i32 = arith.constant 0 : i32
    %c0_i32_0 = arith.constant 0 : i32
    return %arg0, %c0_i32 : i32, i32
  }
}

</mosaic_0001>

<bundles_post_ra>
// kernel: gcn_forward.3
= control target key start
LH: loop header
LB: loop body
LE: loop exit
PB: predicated region body
PF: predicated region fallthrough
CT: control target
= control target key end

     0   :  { %s959_s1 = inlined_call_operand.vmem [shape: bf16[128,128], index: 1, kind: input, shape index: {}]   ;;  %s960_s0 = inlined_call_operand.vmem [shape: bf16[256,128], index: 0, kind: input, shape index: {}]   ;;  %s961_s2 = inlined_call_operand.vmem [shape: bf16[256,128], index: 2, kind: output, shape index: {}]  }
   0x1   :  { %v800_v0 = vld [vmem:[%s959_s1 + $0x38] sm:$0xff]   ;;  %v801_v1 = vld [vmem:[%s959_s1 + $0x30] sm:$0xff]   ;;  %v802_v2 = vld [vmem:[%s959_s1 + $0x28] sm:$0xff]  }
   0x2   :  { %736 = vmatprep.subr.bf16.mxu0 %v800_v0  ;;  %784 = vmatprep.subr.bf16.mxu1 %v800_v0  ;;  %v803_v3 = vld [vmem:[%s959_s1 + $0x20] sm:$0xff]   ;;  %v804_v6 = vld [vmem:[%s959_s1 + $0x18] sm:$0xff]   ;;  %v805_v7 = vld [vmem:[%s959_s1 + $0x10] sm:$0xff]  }
   0x3   :  { %737 = vmatpush3.bf16.msra.mxu0 %v800_v0  ;;  %792 = vmatpush3.bf16.msra.mxu1 %v800_v0  ;;  %v808_v4 = vld [vmem:[%s960_s0] sm:$0xff]   ;;  %v806_v8 = vld [vmem:[%s959_s1 + $0x8] sm:$0xff]   ;;  %v812_v12 = vld [vmem:[%s960_s0 + $0x10] sm:$0xff]  }
   0x4   :  { %738 = vmatprep.subr.bf16.mxu0 %v801_v1  ;;  %785 = vmatprep.subr.bf16.mxu1 %v801_v1  ;;  %v809_v5 = vld [vmem:[%s960_s0 + $0x40] sm:$0xff]   ;;  %v810_v10 = vld [vmem:[%s960_s0 + $0x8] sm:$0xff]   ;;  %v813_v13 = vld [vmem:[%s960_s0 + $0x50] sm:$0xff]  }
   0x5   :  { %752 = vmatprep.mubr.bf16.mxu0 %v808_v4  ;;  %768 = vmatprep.mubr.bf16.mxu1 %v809_v5  ;;  %v807_v9 = vld [vmem:[%s959_s1] sm:$0xff]   ;;  %v811_v11 = vld [vmem:[%s960_s0 + $0x48] sm:$0xff]   ;;  %v814_v14 = vld [vmem:[%s960_s0 + $0x18] sm:$0xff]  }
   0x6   :  { %v815_v15 = vld [vmem:[%s960_s0 + $0x58] sm:$0xff]   ;;  %v816_v16 = vld [vmem:[%s960_s0 + $0x20] sm:$0xff]   ;;  %v818_v18 = vld [vmem:[%s960_s0 + $0x28] sm:$0xff]  }
   0x7   :  { %739 = vmatpush3.bf16.msra.mxu0 %v801_v1  ;;  %793 = vmatpush3.bf16.msra.mxu1 %v801_v1  ;;  %v817_v17 = vld [vmem:[%s960_s0 + $0x60] sm:$0xff]   ;;  %v819_v19 = vld [vmem:[%s960_s0 + $0x68] sm:$0xff]   ;;  %v820_v20 = vld [vmem:[%s960_s0 + $0x30] sm:$0xff]  }
   0x8   :  { %740 = vmatprep.subr.bf16.mxu0 %v802_v2  ;;  %786 = vmatprep.subr.bf16.mxu1 %v802_v2  ;;  %v821_v21 = vld [vmem:[%s960_s0 + $0x70] sm:$0xff]   ;;  %v822_v22 = vld [vmem:[%s960_s0 + $0x38] sm:$0xff]  }
   0x9   :  { %v823_v23 = vld [vmem:[%s960_s0 + $0x78] sm:$0xff]  }
   0xb   :  { %741 = vmatpush3.bf16.msra.mxu0 %v802_v2  ;;  %794 = vmatpush3.bf16.msra.mxu1 %v802_v2 }
   0xc   :  { %742 = vmatprep.subr.bf16.mxu0 %v803_v3  ;;  %787 = vmatprep.subr.bf16.mxu1 %v803_v3 }
   0xf   :  { %743 = vmatpush3.bf16.msra.mxu0 %v803_v3  ;;  %795 = vmatpush3.bf16.msra.mxu1 %v803_v3 }
  0x10   :  { %744 = vmatprep.subr.bf16.mxu0 %v804_v6  ;;  %788 = vmatprep.subr.bf16.mxu1 %v804_v6 }
  0x13   :  { %745 = vmatpush3.bf16.msra.mxu0 %v804_v6  ;;  %796 = vmatpush3.bf16.msra.mxu1 %v804_v6 }
  0x14   :  { %746 = vmatprep.subr.bf16.mxu0 %v805_v7  ;;  %789 = vmatprep.subr.bf16.mxu1 %v805_v7 }
  0x17   :  { %747 = vmatpush3.bf16.msra.mxu0 %v805_v7  ;;  %797 = vmatpush3.bf16.msra.mxu1 %v805_v7 }
  0x18   :  { %748 = vmatprep.subr.bf16.mxu0 %v806_v8  ;;  %790 = vmatprep.subr.bf16.mxu1 %v806_v8 }
  0x1b   :  { %749 = vmatpush3.bf16.msra.mxu0 %v806_v8  ;;  %798 = vmatpush3.bf16.msra.mxu1 %v806_v8 }
  0x1c   :  { %750 = vmatprep.subr.bf16.mxu0 %v807_v9  ;;  %791 = vmatprep.subr.bf16.mxu1 %v807_v9 }
  0x1f   :  { %751 = vmatpush3.bf16.msra.mxu0 %v807_v9  ;;  %799 = vmatpush3.bf16.msra.mxu1 %v807_v9 }
  0x22   :  { %753 = vmatmul.mubr.bf16.vlgmr.msra.gmra.mxu0 %v810_v10  ;;  %769 = vmatmul.mubr.bf16.vlgmr.msra.gmra.mxu1 %v811_v11 }
  0x23   :  { %756 = vmatprep.mubr.bf16.mxu0 %v812_v12  ;;  %772 = vmatprep.mubr.bf16.mxu1 %v813_v13 }
  0x2a   :  { %757 = vmatmul.mubr.bf16.gmra.mxu0 %v814_v14  ;;  %773 = vmatmul.mubr.bf16.gmra.mxu1 %v815_v15 }
  0x2b   :  { %760 = vmatprep.mubr.bf16.mxu0 %v816_v16  ;;  %776 = vmatprep.mubr.bf16.mxu1 %v817_v17 }
  0x32   :  { %761 = vmatmul.mubr.bf16.gmra.mxu0 %v818_v18  ;;  %777 = vmatmul.mubr.bf16.gmra.mxu1 %v819_v19 }
  0x33   :  { %764 = vmatprep.mubr.bf16.mxu0 %v820_v20  ;;  %780 = vmatprep.mubr.bf16.mxu1 %v821_v21 }
  0x3a   :  { %765 = vmatmul.mubr.bf16.gmra.mxu0 %v822_v22  ;;  %781 = vmatmul.mubr.bf16.gmra.mxu1 %v823_v23 }
  0xe2   :  { %v754_v24 = vpop.f32.mrf.mxu0  ;;  %v770_v25 = vpop.f32.mrf.mxu1 }
  0xe4   :  { %v238_v26 = vpop.f32.mrf.mxu0  ;;  %v302_v27 = vpop.f32.mrf.mxu1 }
  0xe6   :  { %v755_v28 = vpop.f32.mrf.mxu0  ;;  %v771_v29 = vpop.f32.mrf.mxu1 }
  0xe7   :  { %v625_v30 = vpack.c.bf16 %v755_v28, %v754_v24  ;;  %v665_v31 = vpack.c.bf16 %v771_v29, %v770_v25 }
  0xe8   :  { %v241_v32 = vpop.f32.mrf.mxu0  ;;  %v305_v33 = vpop.f32.mrf.mxu1 }
  0xe9   :  { %697 = vst [vmem:[%s961_s2 + $0x8] sm:$0xff] %v625_v30   ;;  %705 = vst [vmem:[%s961_s2 + $0x48] sm:$0xff] %v665_v31   ;;  %v620_v34 = vpack.c.bf16 %v241_v32, %v238_v26  ;;  %v660_v35 = vpack.c.bf16 %v305_v33, %v302_v27 }
  0xea   :  { %v758_v36 = vpop.f32.mrf.mxu0  ;;  %v774_v37 = vpop.f32.mrf.mxu1 }
  0xeb   :  { %621 = vst [vmem:[%s961_s2] sm:$0xff] %v620_v34   ;;  %704 = vst [vmem:[%s961_s2 + $0x40] sm:$0xff] %v660_v35  }
  0xec   :  { %v254_v38 = vpop.f32.mrf.mxu0  ;;  %v318_v39 = vpop.f32.mrf.mxu1 }
  0xee   :  { %v759_v40 = vpop.f32.mrf.mxu0  ;;  %v775_v41 = vpop.f32.mrf.mxu1 }
  0xef   :  { %v635_v42 = vpack.c.bf16 %v759_v40, %v758_v36  ;;  %v675_v43 = vpack.c.bf16 %v775_v41, %v774_v37 }
  0xf0   :  { %v257_v44 = vpop.f32.mrf.mxu0  ;;  %v321_v45 = vpop.f32.mrf.mxu1 }
  0xf1   :  { %699 = vst [vmem:[%s961_s2 + $0x18] sm:$0xff] %v635_v42   ;;  %707 = vst [vmem:[%s961_s2 + $0x58] sm:$0xff] %v675_v43   ;;  %v630_v46 = vpack.c.bf16 %v257_v44, %v254_v38  ;;  %v670_v47 = vpack.c.bf16 %v321_v45, %v318_v39 }
  0xf2   :  { %v762_v48 = vpop.f32.mrf.mxu0  ;;  %v778_v49 = vpop.f32.mrf.mxu1 }
  0xf3   :  { %698 = vst [vmem:[%s961_s2 + $0x10] sm:$0xff] %v630_v46   ;;  %706 = vst [vmem:[%s961_s2 + $0x50] sm:$0xff] %v670_v47  }
  0xf4   :  { %v270_v50 = vpop.f32.mrf.mxu0  ;;  %v334_v51 = vpop.f32.mrf.mxu1 }
  0xf6   :  { %v763_v52 = vpop.f32.mrf.mxu0  ;;  %v779_v53 = vpop.f32.mrf.mxu1 }
  0xf7   :  { %v645_v54 = vpack.c.bf16 %v763_v52, %v762_v48  ;;  %v685_v55 = vpack.c.bf16 %v779_v53, %v778_v49 }
  0xf8   :  { %v273_v56 = vpop.f32.mrf.mxu0  ;;  %v337_v57 = vpop.f32.mrf.mxu1 }
  0xf9   :  { %701 = vst [vmem:[%s961_s2 + $0x28] sm:$0xff] %v645_v54   ;;  %709 = vst [vmem:[%s961_s2 + $0x68] sm:$0xff] %v685_v55   ;;  %v640_v58 = vpack.c.bf16 %v273_v56, %v270_v50  ;;  %v680_v59 = vpack.c.bf16 %v337_v57, %v334_v51 }
  0xfa   :  { %v766_v60 = vpop.f32.mrf.mxu0  ;;  %v782_v61 = vpop.f32.mrf.mxu1 }
  0xfb   :  { %700 = vst [vmem:[%s961_s2 + $0x20] sm:$0xff] %v640_v58   ;;  %708 = vst [vmem:[%s961_s2 + $0x60] sm:$0xff] %v680_v59  }
  0xfc   :  { %v286_v62 = vpop.f32.mrf.mxu0  ;;  %v350_v63 = vpop.f32.mrf.mxu1 }
  0xfe   :  { %v767_v0 = vpop.f32.mrf.mxu0  ;;  %v783_v1 = vpop.f32.mrf.mxu1 }
  0xff   :  { %v655_v2 = vpack.c.bf16 %v767_v0, %v766_v60  ;;  %v695_v3 = vpack.c.bf16 %v783_v1, %v782_v61 }
 0x100   :  { %v289_v4 = vpop.f32.mrf.mxu0  ;;  %v353_v5 = vpop.f32.mrf.mxu1 }
 0x101   :  { %703 = vst [vmem:[%s961_s2 + $0x38] sm:$0xff] %v655_v2   ;;  %711 = vst [vmem:[%s961_s2 + $0x78] sm:$0xff] %v695_v3   ;;  %v650_v6 = vpack.c.bf16 %v289_v4, %v286_v62  ;;  %v690_v7 = vpack.c.bf16 %v353_v5, %v350_v63 }
 0x103   :  { %702 = vst [vmem:[%s961_s2 + $0x30] sm:$0xff] %v650_v6   ;;  %710 = vst [vmem:[%s961_s2 + $0x70] sm:$0xff] %v690_v7  }

// kernel: gcn_forward.5
= control target key start
LH: loop header
LB: loop body
LE: loop exit
PB: predicated region body
PF: predicated region fallthrough
CT: control target
= control target key end

     0   :  { %s1004_s1 = inlined_call_operand.vmem [shape: bf16[256,128], index: 1, kind: input, shape index: {}]   ;;  %s1005_s0 = inlined_call_operand.vmem [shape: s8[256,256], index: 0, kind: input, shape index: {}]   ;;  %s1006_s2 = inlined_call_operand.vmem [shape: f32[1,128], index: 2, kind: input, shape index: {}]   ;;  %s1007_s3 = inlined_call_operand.vmem [shape: f32[256,128], index: 3, kind: output, shape index: {}]  }
   0x1   :  { %v739_v0 = vld [vmem:[%s1004_s1 + $0x78] sm:$0xff]   ;;  %v741_v2 = vld [vmem:[%s1004_s1 + $0x70] sm:$0xff]   ;;  %v743_v4 = vld [vmem:[%s1004_s1 + $0x68] sm:$0xff]  }
   0x2   :  { %v740_v1 = vld [vmem:[%s1004_s1 + $0x38] sm:$0xff]   ;;  %611 = vmatprep.subr.bf16.mxu0 %v739_v0  ;;  %723 = vmatprep.subr.bf16.mxu1 %v739_v0  ;;  %v742_v3 = vld [vmem:[%s1004_s1 + $0x30] sm:$0xff]   ;;  %v744_v5 = vld [vmem:[%s1004_s1 + $0x28] sm:$0xff]  }
   0x3   :  { %612 = vmatpush3.bf16.msra.mxu0 %v740_v1  ;;  %731 = vmatpush3.bf16.msra.mxu1 %v740_v1  ;;  %v745_v6 = vld [vmem:[%s1004_s1 + $0x60] sm:$0xff]   ;;  %v747_v8 = vld [vmem:[%s1004_s1 + $0x58] sm:$0xff]   ;;  %v749_v10 = vld [vmem:[%s1004_s1 + $0x50] sm:$0xff]  }
   0x4   :  { %613 = vmatprep.subr.bf16.mxu0 %v741_v2  ;;  %724 = vmatprep.subr.bf16.mxu1 %v741_v2  ;;  %v746_v7 = vld [vmem:[%s1004_s1 + $0x20] sm:$0xff]   ;;  %v748_v9 = vld [vmem:[%s1004_s1 + $0x18] sm:$0xff]   ;;  %v52_v11 = vld [vmem:[%s1005_s0 + $0x8] sm:$0xff] }
   0x5   :  { %v60_v12 = vld [vmem:[%s1005_s0 + $0x48] sm:$0xff]  ;;  %v68_v13 = vunpack.c.l.s8.bf16 %v52_v11  ;;  %v750_v15 = vld [vmem:[%s1004_s1 + $0x10] sm:$0xff]   ;;  %v753_v18 = vld [vmem:[%s1004_s1 + $0x40] sm:$0xff]   ;;  %v70_v24 = vunpack.c.h.s8.bf16 %v52_v11 }
   0x6   :  { %v84_v14 = vunpack.c.l.s8.bf16 %v60_v12  ;;  %v751_v16 = vld [vmem:[%s1004_s1 + $0x48] sm:$0xff]   ;;  %v754_v19 = vld [vmem:[%s1004_s1] sm:$0xff]   ;;  %v86_v25 = vunpack.c.h.s8.bf16 %v60_v12  ;;  %v54_v26 = vld [vmem:[%s1005_s0 + $0x18] sm:$0xff] }
   0x7   :  { %614 = vmatpush3.bf16.msra.mxu0 %v742_v3  ;;  %732 = vmatpush3.bf16.msra.mxu1 %v742_v3  ;;  %v752_v17 = vld [vmem:[%s1004_s1 + $0x8] sm:$0xff]   ;;  %v51_v20 = vld [vmem:[%s1005_s0] sm:$0xff]  ;;  %v62_v27 = vld [vmem:[%s1005_s0 + $0x58] sm:$0xff]  ;;  %v72_v30 = vunpack.c.l.s8.bf16 %v54_v26  ;;  %v74_v36 = vunpack.c.h.s8.bf16 %v54_v26 }
   0x8   :  { %615 = vmatprep.subr.bf16.mxu0 %v743_v4  ;;  %725 = vmatprep.subr.bf16.mxu1 %v743_v4  ;;  %v59_v21 = vld [vmem:[%s1005_s0 + $0x40] sm:$0xff]  ;;  %v67_v22 = vunpack.c.l.s8.bf16 %v51_v20  ;;  %v69_v28 = vunpack.c.h.s8.bf16 %v51_v20  ;;  %v88_v31 = vunpack.c.l.s8.bf16 %v62_v27  ;;  %v53_v32 = vld [vmem:[%s1005_s0 + $0x10] sm:$0xff]  ;;  %v90_v37 = vunpack.c.h.s8.bf16 %v62_v27  ;;  %v56_v38 = vld [vmem:[%s1005_s0 + $0x28] sm:$0xff] }
   0x9   :  { %291 = vmatprep.mubr.bf16.mxu0 %v68_v13  ;;  %355 = vmatprep.mubr.bf16.mxu1 %v84_v14  ;;  %v83_v23 = vunpack.c.l.s8.bf16 %v59_v21  ;;  %v85_v29 = vunpack.c.h.s8.bf16 %v59_v21  ;;  %v61_v33 = vld [vmem:[%s1005_s0 + $0x50] sm:$0xff]  ;;  %v71_v34 = vunpack.c.l.s8.bf16 %v53_v32  ;;  %v64_v39 = vld [vmem:[%s1005_s0 + $0x68] sm:$0xff]  ;;  %v73_v40 = vunpack.c.h.s8.bf16 %v53_v32  ;;  %v55_v44 = vld [vmem:[%s1005_s0 + $0x20] sm:$0xff] }
   0xa   :  { %v87_v35 = vunpack.c.l.s8.bf16 %v61_v33  ;;  %v89_v41 = vunpack.c.h.s8.bf16 %v61_v33  ;;  %v76_v42 = vunpack.c.l.s8.bf16 %v56_v38  ;;  %v92_v43 = vunpack.c.l.s8.bf16 %v64_v39  ;;  %v63_v45 = vld [vmem:[%s1005_s0 + $0x60] sm:$0xff]  ;;  %v58_v50 = vld [vmem:[%s1005_s0 + $0x38] sm:$0xff]  ;;  %v57_v56 = vld [vmem:[%s1005_s0 + $0x30] sm:$0xff] }
   0xb   :  { %616 = vmatpush3.bf16.msra.mxu0 %v744_v5  ;;  %733 = vmatpush3.bf16.msra.mxu1 %v744_v5  ;;  %v75_v46 = vunpack.c.l.s8.bf16 %v55_v44  ;;  %v91_v47 = vunpack.c.l.s8.bf16 %v63_v45  ;;  %v78_v48 = vunpack.c.h.s8.bf16 %v56_v38  ;;  %v94_v49 = vunpack.c.h.s8.bf16 %v64_v39  ;;  %v66_v51 = vld [vmem:[%s1005_s0 + $0x78] sm:$0xff]  ;;  %v65_v57 = vld [vmem:[%s1005_s0 + $0x70] sm:$0xff]  ;;  %v874_v3 = vld [vmem:[%s1006_s2] ss:$0 sm:$0xff] }
   0xc   :  { %617 = vmatprep.subr.bf16.mxu0 %v745_v6  ;;  %726 = vmatprep.subr.bf16.mxu1 %v745_v6  ;;  %v77_v52 = vunpack.c.h.s8.bf16 %v55_v44  ;;  %v93_v53 = vunpack.c.h.s8.bf16 %v63_v45  ;;  %v80_v54 = vunpack.c.l.s8.bf16 %v58_v50  ;;  %v96_v55 = vunpack.c.l.s8.bf16 %v66_v51 }
   0xd   :  { %v79_v58 = vunpack.c.l.s8.bf16 %v57_v56  ;;  %v95_v59 = vunpack.c.l.s8.bf16 %v65_v57  ;;  %v82_v60 = vunpack.c.h.s8.bf16 %v58_v50  ;;  %v98_v61 = vunpack.c.h.s8.bf16 %v66_v51 }
   0xe   :  { %v81_v62 = vunpack.c.h.s8.bf16 %v57_v56  ;;  %v97_v63 = vunpack.c.h.s8.bf16 %v65_v57 }
   0xf   :  { %618 = vmatpush3.bf16.msra.mxu0 %v746_v7  ;;  %734 = vmatpush3.bf16.msra.mxu1 %v746_v7 }
  0x10   :  { %619 = vmatprep.subr.bf16.mxu0 %v747_v8  ;;  %727 = vmatprep.subr.bf16.mxu1 %v747_v8 }
  0x13   :  { %620 = vmatpush3.bf16.msra.mxu0 %v748_v9  ;;  %735 = vmatpush3.bf16.msra.mxu1 %v748_v9 }
  0x14   :  { %621 = vmatprep.subr.bf16.mxu0 %v749_v10  ;;  %728 = vmatprep.subr.bf16.mxu1 %v749_v10 }
  0x17   :  { %622 = vmatpush3.bf16.msra.mxu0 %v750_v15  ;;  %736 = vmatpush3.bf16.msra.mxu1 %v750_v15 }
  0x18   :  { %623 = vmatprep.subr.bf16.mxu0 %v751_v16  ;;  %729 = vmatprep.subr.bf16.mxu1 %v751_v16 }
  0x1b   :  { %624 = vmatpush3.bf16.msra.mxu0 %v752_v17  ;;  %737 = vmatpush3.bf16.msra.mxu1 %v752_v17 }
  0x1c   :  { %625 = vmatprep.subr.bf16.mxu0 %v753_v18  ;;  %730 = vmatprep.subr.bf16.mxu1 %v753_v18 }
  0x1f   :  { %626 = vmatpush3.bf16.msra.mxu0 %v754_v19  ;;  %738 = vmatpush3.bf16.msra.mxu1 %v754_v19 }
  0x22   :  { %292 = vmatmul.mubr.bf16.vlgmr.msra.gmra.mxu0 %v67_v22  ;;  %356 = vmatmul.mubr.bf16.vlgmr.msra.gmra.mxu1 %v83_v23 }
  0x23   :  { %299 = vmatprep.mubr.bf16.mxu0 %v70_v24  ;;  %363 = vmatprep.mubr.bf16.mxu1 %v86_v25 }
  0x2a   :  { %300 = vmatmul.mubr.bf16.gmra.mxu0 %v69_v28  ;;  %364 = vmatmul.mubr.bf16.gmra.mxu1 %v85_v29 }
  0x2b   :  { %307 = vmatprep.mubr.bf16.mxu0 %v72_v30  ;;  %371 = vmatprep.mubr.bf16.mxu1 %v88_v31 }
  0x32   :  { %308 = vmatmul.mubr.bf16.gmra.mxu0 %v71_v34  ;;  %372 = vmatmul.mubr.bf16.gmra.mxu1 %v87_v35 }
  0x33   :  { %315 = vmatprep.mubr.bf16.mxu0 %v74_v36  ;;  %379 = vmatprep.mubr.bf16.mxu1 %v90_v37 }
  0x3a   :  { %316 = vmatmul.mubr.bf16.gmra.mxu0 %v73_v40  ;;  %380 = vmatmul.mubr.bf16.gmra.mxu1 %v89_v41 }
  0x3b   :  { %323 = vmatprep.mubr.bf16.mxu0 %v76_v42  ;;  %387 = vmatprep.mubr.bf16.mxu1 %v92_v43 }
  0x42   :  { %324 = vmatmul.mubr.bf16.gmra.mxu0 %v75_v46  ;;  %388 = vmatmul.mubr.bf16.gmra.mxu1 %v91_v47 }
  0x43   :  { %331 = vmatprep.mubr.bf16.mxu0 %v78_v48  ;;  %395 = vmatprep.mubr.bf16.mxu1 %v94_v49 }
  0x4a   :  { %332 = vmatmul.mubr.bf16.gmra.mxu0 %v77_v52  ;;  %396 = vmatmul.mubr.bf16.gmra.mxu1 %v93_v53 }
  0x4b   :  { %339 = vmatprep.mubr.bf16.mxu0 %v80_v54  ;;  %403 = vmatprep.mubr.bf16.mxu1 %v96_v55 }
  0x52   :  { %340 = vmatmul.mubr.bf16.gmra.mxu0 %v79_v58  ;;  %404 = vmatmul.mubr.bf16.gmra.mxu1 %v95_v59 }
  0x53   :  { %347 = vmatprep.mubr.bf16.mxu0 %v82_v60  ;;  %411 = vmatprep.mubr.bf16.mxu1 %v98_v61 }
  0x5a   :  { %348 = vmatmul.mubr.bf16.gmra.mxu0 %v81_v62  ;;  %412 = vmatmul.mubr.bf16.gmra.mxu1 %v97_v63 }
  0xe2   :  { %v627_v0 = vpop.f32.mrf.mxu0  ;;  %v675_v1 = vpop.f32.mrf.mxu1 }
  0xe4   :  { %v628_v2 = vpop.f32.mrf.mxu0  ;;  %v676_v4 = vpop.f32.mrf.mxu1 }
  0xe5   :  { %v629_v5 = vadd.f32 %v628_v2, %v627_v0  ;;  %v677_v6 = vadd.f32 %v676_v4, %v675_v1 }
  0xe6   :  { %v630_v7 = vpop.f32.mrf.mxu0  ;;  %v678_v8 = vpop.f32.mrf.mxu1 }
  0xe7   :  { %v526_v9 = vadd.f32 %v629_v5, %v874_v3  ;;  %v542_v10 = vadd.f32 %v677_v6, %v874_v3 }
  0xe8   :  { %v631_v11 = vpop.f32.mrf.mxu0  ;;  %v679_v12 = vpop.f32.mrf.mxu1 }
  0xe9   :  { %558 = vst [vmem:[%s1007_s3] sm:$0xff] %v526_v9  ;;  %574 = vst [vmem:[%s1007_s3 + $0x80] sm:$0xff] %v542_v10  ;;  %v632_v13 = vadd.f32 %v631_v11, %v630_v7  ;;  %v680_v14 = vadd.f32 %v679_v12, %v678_v8 }
  0xea   :  { %v633_v15 = vpop.f32.mrf.mxu0  ;;  %v681_v16 = vpop.f32.mrf.mxu1 }
  0xeb   :  { %v527_v17 = vadd.f32 %v632_v13, %v874_v3  ;;  %v543_v18 = vadd.f32 %v680_v14, %v874_v3 }
  0xec   :  { %v634_v19 = vpop.f32.mrf.mxu0  ;;  %v682_v20 = vpop.f32.mrf.mxu1 }
  0xed   :  { %559 = vst [vmem:[%s1007_s3 + $0x8] sm:$0xff] %v527_v17  ;;  %575 = vst [vmem:[%s1007_s3 + $0x88] sm:$0xff] %v543_v18  ;;  %v635_v21 = vadd.f32 %v634_v19, %v633_v15  ;;  %v683_v22 = vadd.f32 %v682_v20, %v681_v16 }
  0xee   :  { %v636_v23 = vpop.f32.mrf.mxu0  ;;  %v684_v24 = vpop.f32.mrf.mxu1 }
  0xef   :  { %v528_v25 = vadd.f32 %v635_v21, %v874_v3  ;;  %v544_v26 = vadd.f32 %v683_v22, %v874_v3 }
  0xf0   :  { %v637_v27 = vpop.f32.mrf.mxu0  ;;  %v685_v28 = vpop.f32.mrf.mxu1 }
  0xf1   :  { %560 = vst [vmem:[%s1007_s3 + $0x10] sm:$0xff] %v528_v25  ;;  %576 = vst [vmem:[%s1007_s3 + $0x90] sm:$0xff] %v544_v26  ;;  %v638_v29 = vadd.f32 %v637_v27, %v636_v23  ;;  %v686_v30 = vadd.f32 %v685_v28, %v684_v24 }
  0xf2   :  { %v639_v31 = vpop.f32.mrf.mxu0  ;;  %v687_v32 = vpop.f32.mrf.mxu1 }
  0xf3   :  { %v529_v33 = vadd.f32 %v638_v29, %v874_v3  ;;  %v545_v34 = vadd.f32 %v686_v30, %v874_v3 }
  0xf4   :  { %v640_v35 = vpop.f32.mrf.mxu0  ;;  %v688_v36 = vpop.f32.mrf.mxu1 }
  0xf5   :  { %561 = vst [vmem:[%s1007_s3 + $0x18] sm:$0xff] %v529_v33  ;;  %577 = vst [vmem:[%s1007_s3 + $0x98] sm:$0xff] %v545_v34  ;;  %v641_v37 = vadd.f32 %v640_v35, %v639_v31  ;;  %v689_v38 = vadd.f32 %v688_v36, %v687_v32 }
  0xf6   :  { %v642_v39 = vpop.f32.mrf.mxu0  ;;  %v690_v40 = vpop.f32.mrf.mxu1 }
  0xf7   :  { %v530_v41 = vadd.f32 %v641_v37, %v874_v3  ;;  %v546_v42 = vadd.f32 %v689_v38, %v874_v3 }
  0xf8   :  { %v643_v43 = vpop.f32.mrf.mxu0  ;;  %v691_v44 = vpop.f32.mrf.mxu1 }
  0xf9   :  { %562 = vst [vmem:[%s1007_s3 + $0x20] sm:$0xff] %v530_v41  ;;  %578 = vst [vmem:[%s1007_s3 + $0xa0] sm:$0xff] %v546_v42  ;;  %v644_v45 = vadd.f32 %v643_v43, %v642_v39  ;;  %v692_v46 = vadd.f32 %v691_v44, %v690_v40 }
  0xfa   :  { %v645_v47 = vpop.f32.mrf.mxu0  ;;  %v693_v48 = vpop.f32.mrf.mxu1 }
  0xfb   :  { %v531_v49 = vadd.f32 %v644_v45, %v874_v3  ;;  %v547_v50 = vadd.f32 %v692_v46, %v874_v3 }
  0xfc   :  { %v646_v51 = vpop.f32.mrf.mxu0  ;;  %v694_v52 = vpop.f32.mrf.mxu1 }
  0xfd   :  { %563 = vst [vmem:[%s1007_s3 + $0x28] sm:$0xff] %v531_v49  ;;  %579 = vst [vmem:[%s1007_s3 + $0xa8] sm:$0xff] %v547_v50  ;;  %v647_v53 = vadd.f32 %v646_v51, %v645_v47  ;;  %v695_v54 = vadd.f32 %v694_v52, %v693_v48 }
  0xfe   :  { %v648_v55 = vpop.f32.mrf.mxu0  ;;  %v696_v56 = vpop.f32.mrf.mxu1 }
  0xff   :  { %v532_v57 = vadd.f32 %v647_v53, %v874_v3  ;;  %v548_v58 = vadd.f32 %v695_v54, %v874_v3 }
 0x100   :  { %v649_v59 = vpop.f32.mrf.mxu0  ;;  %v697_v60 = vpop.f32.mrf.mxu1 }
 0x101   :  { %564 = vst [vmem:[%s1007_s3 + $0x30] sm:$0xff] %v532_v57  ;;  %580 = vst [vmem:[%s1007_s3 + $0xb0] sm:$0xff] %v548_v58  ;;  %v650_v61 = vadd.f32 %v649_v59, %v648_v55  ;;  %v698_v62 = vadd.f32 %v697_v60, %v696_v56 }
 0x102   :  { %v651_v63 = vpop.f32.mrf.mxu0  ;;  %v699_v0 = vpop.f32.mrf.mxu1 }
 0x103   :  { %v533_v1 = vadd.f32 %v650_v61, %v874_v3  ;;  %v549_v2 = vadd.f32 %v698_v62, %v874_v3 }
 0x104   :  { %v652_v4 = vpop.f32.mrf.mxu0  ;;  %v700_v5 = vpop.f32.mrf.mxu1 }
 0x105   :  { %565 = vst [vmem:[%s1007_s3 + $0x38] sm:$0xff] %v533_v1  ;;  %581 = vst [vmem:[%s1007_s3 + $0xb8] sm:$0xff] %v549_v2  ;;  %v653_v6 = vadd.f32 %v652_v4, %v651_v63  ;;  %v701_v7 = vadd.f32 %v700_v5, %v699_v0 }
 0x106   :  { %v654_v8 = vpop.f32.mrf.mxu0  ;;  %v702_v9 = vpop.f32.mrf.mxu1 }
 0x107   :  { %v534_v10 = vadd.f32 %v653_v6, %v874_v3  ;;  %v550_v11 = vadd.f32 %v701_v7, %v874_v3 }
 0x108   :  { %v655_v12 = vpop.f32.mrf.mxu0  ;;  %v703_v13 = vpop.f32.mrf.mxu1 }
 0x109   :  { %566 = vst [vmem:[%s1007_s3 + $0x40] sm:$0xff] %v534_v10  ;;  %582 = vst [vmem:[%s1007_s3 + $0xc0] sm:$0xff] %v550_v11  ;;  %v656_v14 = vadd.f32 %v655_v12, %v654_v8  ;;  %v704_v15 = vadd.f32 %v703_v13, %v702_v9 }
 0x10a   :  { %v657_v16 = vpop.f32.mrf.mxu0  ;;  %v705_v17 = vpop.f32.mrf.mxu1 }
 0x10b   :  { %v535_v18 = vadd.f32 %v656_v14, %v874_v3  ;;  %v551_v19 = vadd.f32 %v704_v15, %v874_v3 }
 0x10c   :  { %v658_v20 = vpop.f32.mrf.mxu0  ;;  %v706_v21 = vpop.f32.mrf.mxu1 }
 0x10d   :  { %567 = vst [vmem:[%s1007_s3 + $0x48] sm:$0xff] %v535_v18  ;;  %583 = vst [vmem:[%s1007_s3 + $0xc8] sm:$0xff] %v551_v19  ;;  %v659_v22 = vadd.f32 %v658_v20, %v657_v16  ;;  %v707_v23 = vadd.f32 %v706_v21, %v705_v17 }
 0x10e   :  { %v660_v24 = vpop.f32.mrf.mxu0  ;;  %v708_v25 = vpop.f32.mrf.mxu1 }
 0x10f   :  { %v536_v26 = vadd.f32 %v659_v22, %v874_v3  ;;  %v552_v27 = vadd.f32 %v707_v23, %v874_v3 }
 0x110   :  { %v661_v28 = vpop.f32.mrf.mxu0  ;;  %v709_v29 = vpop.f32.mrf.mxu1 }
 0x111   :  { %568 = vst [vmem:[%s1007_s3 + $0x50] sm:$0xff] %v536_v26  ;;  %584 = vst [vmem:[%s1007_s3 + $0xd0] sm:$0xff] %v552_v27  ;;  %v662_v30 = vadd.f32 %v661_v28, %v660_v24  ;;  %v710_v31 = vadd.f32 %v709_v29, %v708_v25 }
 0x112   :  { %v663_v32 = vpop.f32.mrf.mxu0  ;;  %v711_v33 = vpop.f32.mrf.mxu1 }
 0x113   :  { %v537_v34 = vadd.f32 %v662_v30, %v874_v3  ;;  %v553_v35 = vadd.f32 %v710_v31, %v874_v3 }
 0x114   :  { %v664_v36 = vpop.f32.mrf.mxu0  ;;  %v712_v37 = vpop.f32.mrf.mxu1 }
 0x115   :  { %569 = vst [vmem:[%s1007_s3 + $0x58] sm:$0xff] %v537_v34  ;;  %585 = vst [vmem:[%s1007_s3 + $0xd8] sm:$0xff] %v553_v35  ;;  %v665_v38 = vadd.f32 %v664_v36, %v663_v32  ;;  %v713_v39 = vadd.f32 %v712_v37, %v711_v33 }
 0x116   :  { %v666_v40 = vpop.f32.mrf.mxu0  ;;  %v714_v41 = vpop.f32.mrf.mxu1 }
 0x117   :  { %v538_v42 = vadd.f32 %v665_v38, %v874_v3  ;;  %v554_v43 = vadd.f32 %v713_v39, %v874_v3 }
 0x118   :  { %v667_v44 = vpop.f32.mrf.mxu0  ;;  %v715_v45 = vpop.f32.mrf.mxu1 }
 0x119   :  { %570 = vst [vmem:[%s1007_s3 + $0x60] sm:$0xff] %v538_v42  ;;  %586 = vst [vmem:[%s1007_s3 + $0xe0] sm:$0xff] %v554_v43  ;;  %v668_v46 = vadd.f32 %v667_v44, %v666_v40  ;;  %v716_v47 = vadd.f32 %v715_v45, %v714_v41 }
 0x11a   :  { %v669_v48 = vpop.f32.mrf.mxu0  ;;  %v717_v49 = vpop.f32.mrf.mxu1 }
 0x11b   :  { %v539_v50 = vadd.f32 %v668_v46, %v874_v3  ;;  %v555_v51 = vadd.f32 %v716_v47, %v874_v3 }
 0x11c   :  { %v670_v52 = vpop.f32.mrf.mxu0  ;;  %v718_v53 = vpop.f32.mrf.mxu1 }
 0x11d   :  { %571 = vst [vmem:[%s1007_s3 + $0x68] sm:$0xff] %v539_v50  ;;  %587 = vst [vmem:[%s1007_s3 + $0xe8] sm:$0xff] %v555_v51  ;;  %v671_v54 = vadd.f32 %v670_v52, %v669_v48  ;;  %v719_v55 = vadd.f32 %v718_v53, %v717_v49 }
 0x11e   :  { %v672_v56 = vpop.f32.mrf.mxu0  ;;  %v720_v57 = vpop.f32.mrf.mxu1 }
 0x11f   :  { %v540_v58 = vadd.f32 %v671_v54, %v874_v3  ;;  %v556_v59 = vadd.f32 %v719_v55, %v874_v3 }
 0x120   :  { %v673_v60 = vpop.f32.mrf.mxu0  ;;  %v721_v61 = vpop.f32.mrf.mxu1 }
 0x121   :  { %572 = vst [vmem:[%s1007_s3 + $0x70] sm:$0xff] %v540_v58  ;;  %588 = vst [vmem:[%s1007_s3 + $0xf0] sm:$0xff] %v556_v59  ;;  %v674_v62 = vadd.f32 %v673_v60, %v672_v56  ;;  %v722_v63 = vadd.f32 %v721_v61, %v720_v57 }
 0x123   :  { %v541_v0 = vadd.f32 %v674_v62, %v874_v3  ;;  %v557_v1 = vadd.f32 %v722_v63, %v874_v3 }
 0x125   :  { %573 = vst [vmem:[%s1007_s3 + $0x78] sm:$0xff] %v541_v0  ;;  %589 = vst [vmem:[%s1007_s3 + $0xf8] sm:$0xff] %v557_v1 }

// kernel: gcn_forward.4
= control target key start
LH: loop header
LB: loop body
LE: loop exit
PB: predicated region body
PF: predicated region fallthrough
CT: control target
= control target key end

     0   :  { %s1654_s1 = inlined_call_operand.vmem [shape: bf16[256,128], index: 1, kind: input, shape index: {}]   ;;  %s1655_s0 = inlined_call_operand.vmem [shape: s8[256,256], index: 0, kind: input, shape index: {}]   ;;  %s1656_s3 = inlined_call_operand.vmem [shape: bf16[128,128], index: 3, kind: input, shape index: {}]   ;;  %s1657_s2 = inlined_call_operand.vmem [shape: f32[1,128], index: 2, kind: input, shape index: {}]   ;;  %s1658_s4 = inlined_call_operand.vmem [shape: bf16[256,128], index: 4, kind: output, shape index: {}]  }
   0x1   :  { %v1382_v0 = vld [vmem:[%s1654_s1 + $0x78] sm:$0xff]   ;;  %v1384_v2 = vld [vmem:[%s1654_s1 + $0x70] sm:$0xff]   ;;  %v1386_v4 = vld [vmem:[%s1654_s1 + $0x68] sm:$0xff]  }
   0x2   :  { %v1383_v1 = vld [vmem:[%s1654_s1 + $0x38] sm:$0xff]   ;;  %1182 = vmatprep.subr.bf16.mxu0 %v1382_v0  ;;  %1366 = vmatprep.subr.bf16.mxu1 %v1382_v0  ;;  %v1385_v3 = vld [vmem:[%s1654_s1 + $0x30] sm:$0xff]   ;;  %v1387_v5 = vld [vmem:[%s1654_s1 + $0x28] sm:$0xff]  }
   0x3   :  { %1183 = vmatpush3.bf16.msra.mxu0 %v1383_v1  ;;  %1374 = vmatpush3.bf16.msra.mxu1 %v1383_v1  ;;  %v1388_v6 = vld [vmem:[%s1654_s1 + $0x60] sm:$0xff]   ;;  %v1390_v8 = vld [vmem:[%s1654_s1 + $0x58] sm:$0xff]   ;;  %v1392_v10 = vld [vmem:[%s1654_s1 + $0x50] sm:$0xff]  }
   0x4   :  { %1184 = vmatprep.subr.bf16.mxu0 %v1384_v2  ;;  %1367 = vmatprep.subr.bf16.mxu1 %v1384_v2  ;;  %v1389_v7 = vld [vmem:[%s1654_s1 + $0x20] sm:$0xff]   ;;  %v1391_v9 = vld [vmem:[%s1654_s1 + $0x18] sm:$0xff]   ;;  %v55_v11 = vld [vmem:[%s1655_s0 + $0x8] sm:$0xff] }
   0x5   :  { %v71_v12 = vunpack.c.l.s8.bf16 %v55_v11  ;;  %v1393_v13 = vld [vmem:[%s1654_s1 + $0x10] sm:$0xff]   ;;  %v67_v14 = vld [vmem:[%s1655_s0 + $0x68] sm:$0xff]  ;;  %v1396_v18 = vld [vmem:[%s1654_s1 + $0x40] sm:$0xff]   ;;  %v73_v24 = vunpack.c.h.s8.bf16 %v55_v11 }
   0x6   :  { %v1394_v15 = vld [vmem:[%s1654_s1 + $0x48] sm:$0xff]   ;;  %v95_v16 = vunpack.c.l.s8.bf16 %v67_v14  ;;  %v1397_v19 = vld [vmem:[%s1654_s1] sm:$0xff]   ;;  %v1398_v22 = vld [vmem:[%s1656_s3 + $0x38] sm:$0xff]   ;;  %v97_v26 = vunpack.c.h.s8.bf16 %v67_v14 }
   0x7   :  { %1185 = vmatpush3.bf16.msra.mxu0 %v1385_v3  ;;  %1375 = vmatpush3.bf16.msra.mxu1 %v1385_v3  ;;  %v1395_v17 = vld [vmem:[%s1654_s1 + $0x8] sm:$0xff]   ;;  %v54_v20 = vld [vmem:[%s1655_s0] sm:$0xff]  ;;  %v1399_v27 = vld [vmem:[%s1656_s3 + $0x30] sm:$0xff]  }
   0x8   :  { %1186 = vmatprep.subr.bf16.mxu0 %v1386_v4  ;;  %1368 = vmatprep.subr.bf16.mxu1 %v1386_v4  ;;  %v66_v21 = vld [vmem:[%s1655_s0 + $0x60] sm:$0xff]  ;;  %v70_v23 = vunpack.c.l.s8.bf16 %v54_v20  ;;  %v57_v28 = vld [vmem:[%s1655_s0 + $0x18] sm:$0xff]  ;;  %v1400_v30 = vld [vmem:[%s1656_s3 + $0x28] sm:$0xff]   ;;  %v72_v31 = vunpack.c.h.s8.bf16 %v54_v20 }
   0x9   :  { %294 = vmatprep.mubr.bf16.mxu0 %v71_v12  ;;  %390 = vmatprep.mubr.bf16.mxu1 %v95_v16  ;;  %v94_v25 = vunpack.c.l.s8.bf16 %v66_v21  ;;  %v69_v29 = vld [vmem:[%s1655_s0 + $0x78] sm:$0xff]  ;;  %v75_v32 = vunpack.c.l.s8.bf16 %v57_v28  ;;  %v96_v33 = vunpack.c.h.s8.bf16 %v66_v21  ;;  %v56_v35 = vld [vmem:[%s1655_s0 + $0x10] sm:$0xff]  ;;  %v77_v38 = vunpack.c.h.s8.bf16 %v57_v28  ;;  %v59_v41 = vld [vmem:[%s1655_s0 + $0x28] sm:$0xff] }
   0xa   :  { %v99_v34 = vunpack.c.l.s8.bf16 %v69_v29  ;;  %v68_v36 = vld [vmem:[%s1655_s0 + $0x70] sm:$0xff]  ;;  %v74_v37 = vunpack.c.l.s8.bf16 %v56_v35  ;;  %v101_v40 = vunpack.c.h.s8.bf16 %v69_v29  ;;  %v76_v42 = vunpack.c.h.s8.bf16 %v56_v35  ;;  %v58_v45 = vld [vmem:[%s1655_s0 + $0x20] sm:$0xff]  ;;  %v61_v48 = vld [vmem:[%s1655_s0 + $0x38] sm:$0xff] }
   0xb   :  { %1187 = vmatpush3.bf16.msra.mxu0 %v1387_v5  ;;  %1376 = vmatpush3.bf16.msra.mxu1 %v1387_v5  ;;  %v98_v39 = vunpack.c.l.s8.bf16 %v68_v36  ;;  %v79_v43 = vunpack.c.l.s8.bf16 %v59_v41  ;;  %v100_v44 = vunpack.c.h.s8.bf16 %v68_v36  ;;  %v78_v46 = vunpack.c.l.s8.bf16 %v58_v45  ;;  %v60_v51 = vld [vmem:[%s1655_s0 + $0x30] sm:$0xff]  ;;  %v63_v54 = vld [vmem:[%s1655_s0 + $0x48] sm:$0xff]  ;;  %v62_v57 = vld [vmem:[%s1655_s0 + $0x40] sm:$0xff] }
   0xc   :  { %1188 = vmatprep.subr.bf16.mxu0 %v1388_v6  ;;  %1369 = vmatprep.subr.bf16.mxu1 %v1388_v6  ;;  %v81_v47 = vunpack.c.h.s8.bf16 %v59_v41  ;;  %v80_v49 = vunpack.c.h.s8.bf16 %v58_v45  ;;  %v83_v50 = vunpack.c.l.s8.bf16 %v61_v48  ;;  %v82_v52 = vunpack.c.l.s8.bf16 %v60_v51  ;;  %v1401_v60 = vld [vmem:[%s1656_s3 + $0x20] sm:$0xff]   ;;  %v65_v61 = vld [vmem:[%s1655_s0 + $0x58] sm:$0xff]  ;;  %v64_v1 = vld [vmem:[%s1655_s0 + $0x50] sm:$0xff] }
   0xd   :  { %v85_v53 = vunpack.c.h.s8.bf16 %v61_v48  ;;  %v84_v55 = vunpack.c.h.s8.bf16 %v60_v51  ;;  %v87_v56 = vunpack.c.l.s8.bf16 %v63_v54  ;;  %v86_v58 = vunpack.c.l.s8.bf16 %v62_v57  ;;  %v1402_v0 = vld [vmem:[%s1656_s3 + $0x18] sm:$0xff]   ;;  %v1403_v2 = vld [vmem:[%s1656_s3 + $0x10] sm:$0xff]   ;;  %v1404_v5 = vld [vmem:[%s1656_s3 + $0x8] sm:$0xff]  }
   0xe   :  { %v89_v59 = vunpack.c.h.s8.bf16 %v63_v54  ;;  %v88_v62 = vunpack.c.h.s8.bf16 %v62_v57  ;;  %v91_v63 = vunpack.c.l.s8.bf16 %v65_v61  ;;  %v90_v3 = vunpack.c.l.s8.bf16 %v64_v1  ;;  %v1405_v6 = vld [vmem:[%s1656_s3] sm:$0xff]  }
   0xf   :  { %1189 = vmatpush3.bf16.msra.mxu0 %v1389_v7  ;;  %1377 = vmatpush3.bf16.msra.mxu1 %v1389_v7  ;;  %v93_v4 = vunpack.c.h.s8.bf16 %v65_v61  ;;  %v92_v7 = vunpack.c.h.s8.bf16 %v64_v1  ;;  %v1554_v11 = vld [vmem:[%s1657_s2] ss:$0 sm:$0xff] }
  0x10   :  { %1190 = vmatprep.subr.bf16.mxu0 %v1390_v8  ;;  %1370 = vmatprep.subr.bf16.mxu1 %v1390_v8 }
  0x13   :  { %1191 = vmatpush3.bf16.msra.mxu0 %v1391_v9  ;;  %1378 = vmatpush3.bf16.msra.mxu1 %v1391_v9 }
  0x14   :  { %1192 = vmatprep.subr.bf16.mxu0 %v1392_v10  ;;  %1371 = vmatprep.subr.bf16.mxu1 %v1392_v10 }
  0x17   :  { %1193 = vmatpush3.bf16.msra.mxu0 %v1393_v13  ;;  %1379 = vmatpush3.bf16.msra.mxu1 %v1393_v13 }
  0x18   :  { %1194 = vmatprep.subr.bf16.mxu0 %v1394_v15  ;;  %1372 = vmatprep.subr.bf16.mxu1 %v1394_v15 }
  0x1b   :  { %1195 = vmatpush3.bf16.msra.mxu0 %v1395_v17  ;;  %1380 = vmatpush3.bf16.msra.mxu1 %v1395_v17 }
  0x1c   :  { %1196 = vmatprep.subr.bf16.mxu0 %v1396_v18  ;;  %1373 = vmatprep.subr.bf16.mxu1 %v1396_v18 }
  0x1f   :  { %1197 = vmatpush3.bf16.msra.mxu0 %v1397_v19  ;;  %1381 = vmatpush3.bf16.msra.mxu1 %v1397_v19 }
  0x20   :  { %1318 = vmatprep.subr.bf16.mxu1 %v1398_v22 }
  0x22   :  { %295 = vmatmul.mubr.bf16.vlgmr.msra.gmra.mxu0 %v70_v23  ;;  %391 = vmatmul.mubr.bf16.vlgmr.msra.gmra.mxu1 %v94_v25 }
  0x23   :  { %302 = vmatprep.mubr.bf16.mxu0 %v73_v24  ;;  %398 = vmatprep.mubr.bf16.mxu1 %v97_v26 }
  0x24   :  { %1319 = vmatpush3.bf16.msra.mxu1 %v1398_v22 }
  0x25   :  { %1320 = vmatprep.subr.bf16.mxu1 %v1399_v27 }
  0x28   :  { %1321 = vmatpush3.bf16.msra.mxu1 %v1399_v27 }
  0x29   :  { %1322 = vmatprep.subr.bf16.mxu1 %v1400_v30 }
  0x2a   :  { %303 = vmatmul.mubr.bf16.gmra.mxu0 %v72_v31  ;;  %399 = vmatmul.mubr.bf16.gmra.mxu1 %v96_v33 }
  0x2b   :  { %310 = vmatprep.mubr.bf16.mxu0 %v75_v32  ;;  %406 = vmatprep.mubr.bf16.mxu1 %v99_v34 }
  0x2c   :  { %1323 = vmatpush3.bf16.msra.mxu1 %v1400_v30 }
  0x2d   :  { %1324 = vmatprep.subr.bf16.mxu1 %v1401_v60 }
  0x30   :  { %1325 = vmatpush3.bf16.msra.mxu1 %v1401_v60 }
  0x31   :  { %1326 = vmatprep.subr.bf16.mxu1 %v1402_v0 }
  0x32   :  { %311 = vmatmul.mubr.bf16.gmra.mxu0 %v74_v37  ;;  %407 = vmatmul.mubr.bf16.gmra.mxu1 %v98_v39 }
  0x33   :  { %318 = vmatprep.mubr.bf16.mxu0 %v77_v38  ;;  %414 = vmatprep.mubr.bf16.mxu1 %v101_v40 }
  0x34   :  { %1327 = vmatpush3.bf16.msra.mxu1 %v1402_v0 }
  0x35   :  { %1328 = vmatprep.subr.bf16.mxu1 %v1403_v2 }
  0x38   :  { %1329 = vmatpush3.bf16.msra.mxu1 %v1403_v2 }
  0x39   :  { %1330 = vmatprep.subr.bf16.mxu1 %v1404_v5 }
  0x3a   :  { %319 = vmatmul.mubr.bf16.gmra.mxu0 %v76_v42  ;;  %415 = vmatmul.mubr.bf16.gmra.mxu1 %v100_v44 }
  0x3b   :  { %326 = vmatprep.mubr.bf16.mxu0 %v79_v43 }
  0x3c   :  { %1331 = vmatpush3.bf16.msra.mxu1 %v1404_v5 }
  0x3d   :  { %1332 = vmatprep.subr.bf16.mxu1 %v1405_v6 }
  0x40   :  { %1333 = vmatpush3.bf16.msra.mxu1 %v1405_v6 }
  0x42   :  { %327 = vmatmul.mubr.bf16.gmra.mxu0 %v78_v46 }
  0x43   :  { %334 = vmatprep.mubr.bf16.mxu0 %v81_v47 }
  0x4a   :  { %335 = vmatmul.mubr.bf16.gmra.mxu0 %v80_v49 }
  0x4b   :  { %342 = vmatprep.mubr.bf16.mxu0 %v83_v50 }
  0x52   :  { %343 = vmatmul.mubr.bf16.gmra.mxu0 %v82_v52 }
  0x53   :  { %350 = vmatprep.mubr.bf16.mxu0 %v85_v53 }
  0x5a   :  { %351 = vmatmul.mubr.bf16.gmra.mxu0 %v84_v55 }
  0x5b   :  { %358 = vmatprep.mubr.bf16.mxu0 %v87_v56 }
  0x62   :  { %359 = vmatmul.mubr.bf16.gmra.mxu0 %v86_v58 }
  0x63   :  { %366 = vmatprep.mubr.bf16.mxu0 %v89_v59 }
  0x6a   :  { %367 = vmatmul.mubr.bf16.gmra.mxu0 %v88_v62 }
  0x6b   :  { %374 = vmatprep.mubr.bf16.mxu0 %v91_v63 }
  0x72   :  { %375 = vmatmul.mubr.bf16.gmra.mxu0 %v90_v3 }
  0x73   :  { %382 = vmatprep.mubr.bf16.mxu0 %v93_v4 }
  0x7a   :  { %383 = vmatmul.mubr.bf16.gmra.mxu0 %v92_v7 }
  0xe2   :  { %v1198_v8 = vpop.f32.mrf.mxu0  ;;  %v1566_v63 = vpop.f32.mrf.mxu1 }
  0xe4   :  { %v1199_v9 = vpop.f32.mrf.mxu0  ;;  %v1568_v6 = vpop.f32.mrf.mxu1 }
  0xe5   :  { %v1200_v10 = vadd.f32 %v1199_v9, %v1198_v8 }
  0xe6   :  { %v1201_v12 = vpop.f32.mrf.mxu0 }
  0xe7   :  { %v529_v14 = vadd.f32 %v1200_v10, %v1554_v11 }
  0xe8   :  { %v1202_v13 = vpop.f32.mrf.mxu0 }
  0xe9   :  { %v1203_v15 = vadd.f32 %v1202_v13, %v1201_v12  ;;  %v561_v19 = vmax.f32 %v529_v14, 0.0  ;;  %v1572_v13 = vpop.f32.mrf.mxu1 }
  0xea   :  { %v1204_v16 = vpop.f32.mrf.mxu0 }
  0xeb   :  { %v530_v17 = vadd.f32 %v1203_v15, %v1554_v11 }
  0xec   :  { %v1205_v18 = vpop.f32.mrf.mxu0 }
  0xed   :  { %v562_v20 = vmax.f32 %v530_v17, 0.0  ;;  %v1206_v21 = vadd.f32 %v1205_v18, %v1204_v16 }
  0xee   :  { %v1207_v22 = vpop.f32.mrf.mxu0 }
  0xef   :  { %v593_v23 = vpack.c.bf16 %v562_v20, %v561_v19  ;;  %v531_v25 = vadd.f32 %v1206_v21, %v1554_v11  ;;  %v1574_v20 = vpop.f32.mrf.mxu1 }
  0xf0   :  { %v1208_v24 = vpop.f32.mrf.mxu0 }
  0xf1   :  { %v1209_v26 = vadd.f32 %v1208_v24, %v1207_v22  ;;  %1334 = vmatprep.mubr.bf16.mxu1 %v593_v23  ;;  %v563_v30 = vmax.f32 %v531_v25, 0.0 }
  0xf2   :  { %v1210_v27 = vpop.f32.mrf.mxu0 }
  0xf3   :  { %v532_v28 = vadd.f32 %v1209_v26, %v1554_v11  ;;  %v1578_v26 = vpop.f32.mrf.mxu1 }
  0xf4   :  { %v1211_v29 = vpop.f32.mrf.mxu0 }
  0xf5   :  { %v564_v31 = vmax.f32 %v532_v28, 0.0  ;;  %v1212_v32 = vadd.f32 %v1211_v29, %v1210_v27 }
  0xf6   :  { %v1213_v33 = vpop.f32.mrf.mxu0 }
  0xf7   :  { %v594_v34 = vpack.c.bf16 %v564_v31, %v563_v30  ;;  %v533_v36 = vadd.f32 %v1212_v32, %v1554_v11 }
  0xf8   :  { %v1214_v35 = vpop.f32.mrf.mxu0 }
  0xf9   :  { %v1215_v37 = vadd.f32 %v1214_v35, %v1213_v33  ;;  %1335 = vmatmul.mubr.bf16.vlgmr.msra.gmra.mxu1 %v594_v34  ;;  %v565_v41 = vmax.f32 %v533_v36, 0.0  ;;  %v1580_v33 = vpop.f32.mrf.mxu1 }
  0xfa   :  { %v1216_v38 = vpop.f32.mrf.mxu0 }
  0xfb   :  { %v534_v39 = vadd.f32 %v1215_v37, %v1554_v11 }
  0xfc   :  { %v1217_v40 = vpop.f32.mrf.mxu0 }
  0xfd   :  { %v566_v42 = vmax.f32 %v534_v39, 0.0  ;;  %v1218_v43 = vadd.f32 %v1217_v40, %v1216_v38  ;;  %v1279_v39 = vpop.f32.mrf.mxu1 }
  0xfe   :  { %v1219_v44 = vpop.f32.mrf.mxu0 }
  0xff   :  { %v595_v45 = vpack.c.bf16 %v566_v42, %v565_v41  ;;  %v535_v47 = vadd.f32 %v1218_v43, %v1554_v11 }
 0x100   :  { %v1220_v46 = vpop.f32.mrf.mxu0 }
 0x101   :  { %v1221_v48 = vadd.f32 %v1220_v46, %v1219_v44  ;;  %1338 = vmatprep.mubr.bf16.mxu1 %v595_v45  ;;  %v567_v52 = vmax.f32 %v535_v47, 0.0  ;;  %v1280_v46 = vpop.f32.mrf.mxu1 }
 0x102   :  { %v1222_v49 = vpop.f32.mrf.mxu0 }
 0x103   :  { %v536_v50 = vadd.f32 %v1221_v48, %v1554_v11 }
 0x104   :  { %v1223_v51 = vpop.f32.mrf.mxu0 }
 0x105   :  { %v568_v53 = vmax.f32 %v536_v50, 0.0  ;;  %v1224_v54 = vadd.f32 %v1223_v51, %v1222_v49 }
 0x106   :  { %v1225_v55 = vpop.f32.mrf.mxu0 }
 0x107   :  { %v596_v56 = vpack.c.bf16 %v568_v53, %v567_v52  ;;  %v537_v58 = vadd.f32 %v1224_v54, %v1554_v11  ;;  %v1282_v52 = vpop.f32.mrf.mxu1 }
 0x108   :  { %v1226_v57 = vpop.f32.mrf.mxu0 }
 0x109   :  { %v1227_v59 = vadd.f32 %v1226_v57, %v1225_v55  ;;  %1339 = vmatmul.mubr.bf16.gmra.mxu1 %v596_v56  ;;  %v569_v0 = vmax.f32 %v537_v58, 0.0 }
 0x10a   :  { %v1228_v60 = vpop.f32.mrf.mxu0 }
 0x10b   :  { %v538_v61 = vadd.f32 %v1227_v59, %v1554_v11  ;;  %v1283_v59 = vpop.f32.mrf.mxu1 }
 0x10c   :  { %v1229_v62 = vpop.f32.mrf.mxu0 }
 0x10d   :  { %v570_v1 = vmax.f32 %v538_v61, 0.0  ;;  %v1230_v2 = vadd.f32 %v1229_v62, %v1228_v60 }
 0x10e   :  { %v1231_v3 = vpop.f32.mrf.mxu0 }
 0x10f   :  { %v597_v4 = vpack.c.bf16 %v570_v1, %v569_v0  ;;  %v539_v7 = vadd.f32 %v1230_v2, %v1554_v11  ;;  %v1285_v2 = vpop.f32.mrf.mxu1 }
 0x110   :  { %v1232_v5 = vpop.f32.mrf.mxu0 }
 0x111   :  { %v1233_v8 = vadd.f32 %v1232_v5, %v1231_v3  ;;  %1342 = vmatprep.mubr.bf16.mxu1 %v597_v4  ;;  %v571_v14 = vmax.f32 %v539_v7, 0.0 }
 0x112   :  { %v1234_v9 = vpop.f32.mrf.mxu0 }
 0x113   :  { %v540_v10 = vadd.f32 %v1233_v8, %v1554_v11 }
 0x114   :  { %v1235_v12 = vpop.f32.mrf.mxu0 }
 0x115   :  { %v572_v15 = vmax.f32 %v540_v10, 0.0  ;;  %v1236_v16 = vadd.f32 %v1235_v12, %v1234_v9  ;;  %v1286_v10 = vpop.f32.mrf.mxu1 }
 0x116   :  { %v1237_v17 = vpop.f32.mrf.mxu0 }
 0x117   :  { %v598_v18 = vpack.c.bf16 %v572_v15, %v571_v14  ;;  %v541_v21 = vadd.f32 %v1236_v16, %v1554_v11 }
 0x118   :  { %v1238_v19 = vpop.f32.mrf.mxu0 }
 0x119   :  { %v1239_v22 = vadd.f32 %v1238_v19, %v1237_v17  ;;  %1343 = vmatmul.mubr.bf16.gmra.mxu1 %v598_v18  ;;  %v573_v27 = vmax.f32 %v541_v21, 0.0  ;;  %v1272_v17 = vadd.f32 %v1568_v6, %v1566_v63  ;;  %v1275_v18 = vadd.f32 %v1574_v20, %v1572_v13  ;;  %v1288_v21 = vpop.f32.mrf.mxu1 }
 0x11a   :  { %v1240_v23 = vpop.f32.mrf.mxu0  ;;  %v1278_v63 = vadd.f32 %v1580_v33, %v1578_v26  ;;  %v1281_v6 = vadd.f32 %v1280_v46, %v1279_v39 }
 0x11b   :  { %v542_v24 = vadd.f32 %v1239_v22, %v1554_v11 }
 0x11c   :  { %v1241_v25 = vpop.f32.mrf.mxu0 }
 0x11d   :  { %v574_v28 = vmax.f32 %v542_v24, 0.0  ;;  %v1242_v29 = vadd.f32 %v1241_v25, %v1240_v23 }
 0x11e   :  { %v1243_v30 = vpop.f32.mrf.mxu0 }
 0x11f   :  { %v599_v31 = vpack.c.bf16 %v574_v28, %v573_v27  ;;  %v543_v34 = vadd.f32 %v1242_v29, %v1554_v11  ;;  %v553_v28 = vadd.f32 %v1272_v17, %v1554_v11  ;;  %v554_v29 = vadd.f32 %v1275_v18, %v1554_v11 }
 0x120   :  { %v1244_v32 = vpop.f32.mrf.mxu0 }
 0x121   :  { %v1245_v35 = vadd.f32 %v1244_v32, %v1243_v30  ;;  %1346 = vmatprep.mubr.bf16.mxu1 %v599_v31  ;;  %v575_v40 = vmax.f32 %v543_v34, 0.0  ;;  %v1289_v31 = vpop.f32.mrf.mxu1  ;;  %v585_v20 = vmax.f32 %v553_v28, 0.0 }
 0x122   :  { %v1246_v36 = vpop.f32.mrf.mxu0 }
 0x123   :  { %v544_v37 = vadd.f32 %v1245_v35, %v1554_v11  ;;  %v586_v35 = vmax.f32 %v554_v29, 0.0 }
 0x124   :  { %v1247_v38 = vpop.f32.mrf.mxu0 }
 0x125   :  { %v576_v41 = vmax.f32 %v544_v37, 0.0  ;;  %v1248_v42 = vadd.f32 %v1247_v38, %v1246_v36  ;;  %v1284_v36 = vadd.f32 %v1283_v59, %v1282_v52  ;;  %v1287_v37 = vadd.f32 %v1286_v10, %v1285_v2  ;;  %v1291_v38 = vpop.f32.mrf.mxu1 }
 0x126   :  { %v1249_v43 = vpop.f32.mrf.mxu0  ;;  %v605_v33 = vpack.c.bf16 %v586_v35, %v585_v20 }
 0x127   :  { %v600_v44 = vpack.c.bf16 %v576_v41, %v575_v40  ;;  %v545_v47 = vadd.f32 %v1248_v42, %v1554_v11  ;;  %v555_v42 = vadd.f32 %v1278_v63, %v1554_v11  ;;  %v1292_v26 = vpop.f32.mrf.mxu1 }
 0x128   :  { %v1250_v45 = vpop.f32.mrf.mxu0 }
 0x129   :  { %v1251_v48 = vadd.f32 %v1250_v45, %v1249_v43  ;;  %1347 = vmatmul.mubr.bf16.gmra.mxu1 %v600_v44  ;;  %v577_v53 = vmax.f32 %v545_v47, 0.0  ;;  %v556_v43 = vadd.f32 %v1281_v6, %v1554_v11  ;;  %v557_v45 = vadd.f32 %v1284_v36, %v1554_v11 }
 0x12a   :  { %v1252_v49 = vpop.f32.mrf.mxu0  ;;  %v558_v47 = vadd.f32 %v1287_v37, %v1554_v11  ;;  %v587_v39 = vmax.f32 %v555_v42, 0.0 }
 0x12b   :  { %v546_v50 = vadd.f32 %v1251_v48, %v1554_v11  ;;  %v588_v46 = vmax.f32 %v556_v43, 0.0  ;;  %v1290_v48 = vadd.f32 %v1289_v31, %v1288_v21 }
 0x12c   :  { %v1253_v51 = vpop.f32.mrf.mxu0 }
 0x12d   :  { %v578_v54 = vmax.f32 %v546_v50, 0.0  ;;  %v1254_v55 = vadd.f32 %v1253_v51, %v1252_v49  ;;  %v1293_v49 = vadd.f32 %v1292_v26, %v1291_v38  ;;  %v589_v50 = vmax.f32 %v557_v45, 0.0 }
 0x12e   :  { %v1255_v56 = vpop.f32.mrf.mxu0  ;;  %v590_v51 = vmax.f32 %v558_v47, 0.0  ;;  %v559_v52 = vadd.f32 %v1290_v48, %v1554_v11 }
 0x12f   :  { %v601_v57 = vpack.c.bf16 %v578_v54, %v577_v53  ;;  %v547_v60 = vadd.f32 %v1254_v55, %v1554_v11  ;;  %v560_v53 = vadd.f32 %v1293_v49, %v1554_v11  ;;  %v606_v54 = vpack.c.bf16 %v588_v46, %v587_v39 }
 0x130   :  { %v1256_v58 = vpop.f32.mrf.mxu0  ;;  %v607_v55 = vpack.c.bf16 %v590_v51, %v589_v50 }
 0x131   :  { %v1257_v61 = vadd.f32 %v1256_v58, %v1255_v56  ;;  %1350 = vmatprep.mubr.bf16.mxu1 %v601_v57  ;;  %v579_v3 = vmax.f32 %v547_v60, 0.0  ;;  %v591_v56 = vmax.f32 %v559_v52, 0.0  ;;  %v592_v57 = vmax.f32 %v560_v53, 0.0 }
 0x132   :  { %v1258_v62 = vpop.f32.mrf.mxu0 }
 0x133   :  { %v548_v0 = vadd.f32 %v1257_v61, %v1554_v11  ;;  %v608_v58 = vpack.c.bf16 %v592_v57, %v591_v56 }
 0x134   :  { %v1259_v1 = vpop.f32.mrf.mxu0 }
 0x135   :  { %v580_v4 = vmax.f32 %v548_v0, 0.0  ;;  %v1260_v5 = vadd.f32 %v1259_v1, %v1258_v62 }
 0x136   :  { %v1261_v7 = vpop.f32.mrf.mxu0 }
 0x137   :  { %v602_v8 = vpack.c.bf16 %v580_v4, %v579_v3  ;;  %v549_v12 = vadd.f32 %v1260_v5, %v1554_v11 }
 0x138   :  { %v1262_v9 = vpop.f32.mrf.mxu0 }
 0x139   :  { %v1263_v14 = vadd.f32 %v1262_v9, %v1261_v7  ;;  %1351 = vmatmul.mubr.bf16.gmra.mxu1 %v602_v8  ;;  %v581_v22 = vmax.f32 %v549_v12, 0.0 }
 0x13a   :  { %v1264_v15 = vpop.f32.mrf.mxu0 }
 0x13b   :  { %v550_v16 = vadd.f32 %v1263_v14, %v1554_v11 }
 0x13c   :  { %v1265_v19 = vpop.f32.mrf.mxu0 }
 0x13d   :  { %v582_v23 = vmax.f32 %v550_v16, 0.0  ;;  %v1266_v24 = vadd.f32 %v1265_v19, %v1264_v15 }
 0x13e   :  { %v1267_v25 = vpop.f32.mrf.mxu0 }
 0x13f   :  { %v603_v27 = vpack.c.bf16 %v582_v23, %v581_v22  ;;  %v551_v32 = vadd.f32 %v1266_v24, %v1554_v11 }
 0x140   :  { %v1268_v30 = vpop.f32.mrf.mxu0 }
 0x141   :  { %v1269_v34 = vadd.f32 %v1268_v30, %v1267_v25  ;;  %1354 = vmatprep.mubr.bf16.mxu1 %v603_v27  ;;  %v583_v40 = vmax.f32 %v551_v32, 0.0 }
 0x143   :  { %v552_v13 = vadd.f32 %v1269_v34, %v1554_v11 }
 0x145   :  { %v584_v41 = vmax.f32 %v552_v13, 0.0 }
 0x147   :  { %v604_v44 = vpack.c.bf16 %v584_v41, %v583_v40 }
 0x149   :  { %1355 = vmatmul.mubr.bf16.gmra.mxu1 %v604_v44 }
 0x14a   :  { %1358 = vmatprep.mubr.bf16.mxu1 %v605_v33 }
 0x151   :  { %1359 = vmatmul.mubr.bf16.gmra.mxu1 %v606_v54 }
 0x152   :  { %1362 = vmatprep.mubr.bf16.mxu1 %v607_v55 }
 0x159   :  { %1363 = vmatmul.mubr.bf16.gmra.mxu1 %v608_v58 }
 0x1b9   :  { %v1336_v59 = vpop.f32.mrf.mxu1 }
 0x1bb   :  { %v707_v60 = vpop.f32.mrf.mxu1 }
 0x1bd   :  { %v1337_v61 = vpop.f32.mrf.mxu1 }
 0x1be   :  { %v1095_v62 = vpack.c.bf16 %v1337_v61, %v1336_v59 }
 0x1bf   :  { %v710_v0 = vpop.f32.mrf.mxu1 }
 0x1c0   :  { %1167 = vst [vmem:[%s1658_s4 + $0x8] sm:$0xff] %v1095_v62   ;;  %v1090_v1 = vpack.c.bf16 %v710_v0, %v707_v60 }
 0x1c2   :  { %1091 = vst [vmem:[%s1658_s4] sm:$0xff] %v1090_v1  }
 0x1c9   :  { %v1340_v11 = vpop.f32.mrf.mxu1 }
 0x1cb   :  { %v723_v2 = vpop.f32.mrf.mxu1 }
 0x1cd   :  { %v1341_v3 = vpop.f32.mrf.mxu1 }
 0x1ce   :  { %v1105_v4 = vpack.c.bf16 %v1341_v3, %v1340_v11 }
 0x1cf   :  { %v726_v5 = vpop.f32.mrf.mxu1 }
 0x1d0   :  { %1169 = vst [vmem:[%s1658_s4 + $0x18] sm:$0xff] %v1105_v4   ;;  %v1100_v7 = vpack.c.bf16 %v726_v5, %v723_v2 }
 0x1d2   :  { %1168 = vst [vmem:[%s1658_s4 + $0x10] sm:$0xff] %v1100_v7  }
 0x1d9   :  { %v1344_v8 = vpop.f32.mrf.mxu1 }
 0x1db   :  { %v739_v9 = vpop.f32.mrf.mxu1 }
 0x1dd   :  { %v1345_v10 = vpop.f32.mrf.mxu1 }
 0x1de   :  { %v1115_v12 = vpack.c.bf16 %v1345_v10, %v1344_v8 }
 0x1df   :  { %v742_v14 = vpop.f32.mrf.mxu1 }
 0x1e0   :  { %1171 = vst [vmem:[%s1658_s4 + $0x28] sm:$0xff] %v1115_v12   ;;  %v1110_v15 = vpack.c.bf16 %v742_v14, %v739_v9 }
 0x1e2   :  { %1170 = vst [vmem:[%s1658_s4 + $0x20] sm:$0xff] %v1110_v15  }
 0x1e9   :  { %v1348_v16 = vpop.f32.mrf.mxu1 }
 0x1eb   :  { %v755_v17 = vpop.f32.mrf.mxu1 }
 0x1ed   :  { %v1349_v18 = vpop.f32.mrf.mxu1 }
 0x1ee   :  { %v1125_v19 = vpack.c.bf16 %v1349_v18, %v1348_v16 }
 0x1ef   :  { %v758_v21 = vpop.f32.mrf.mxu1 }
 0x1f0   :  { %1173 = vst [vmem:[%s1658_s4 + $0x38] sm:$0xff] %v1125_v19   ;;  %v1120_v22 = vpack.c.bf16 %v758_v21, %v755_v17 }
 0x1f2   :  { %1172 = vst [vmem:[%s1658_s4 + $0x30] sm:$0xff] %v1120_v22  }
 0x1f9   :  { %v1352_v23 = vpop.f32.mrf.mxu1 }
 0x1fb   :  { %v771_v24 = vpop.f32.mrf.mxu1 }
 0x1fd   :  { %v1353_v25 = vpop.f32.mrf.mxu1 }
 0x1fe   :  { %v1135_v27 = vpack.c.bf16 %v1353_v25, %v1352_v23 }
 0x1ff   :  { %v774_v28 = vpop.f32.mrf.mxu1 }
 0x200   :  { %1175 = vst [vmem:[%s1658_s4 + $0x48] sm:$0xff] %v1135_v27   ;;  %v1130_v29 = vpack.c.bf16 %v774_v28, %v771_v24 }
 0x202   :  { %1174 = vst [vmem:[%s1658_s4 + $0x40] sm:$0xff] %v1130_v29  }
 0x209   :  { %v1356_v30 = vpop.f32.mrf.mxu1 }
 0x20b   :  { %v787_v31 = vpop.f32.mrf.mxu1 }
 0x20d   :  { %v1357_v32 = vpop.f32.mrf.mxu1 }
 0x20e   :  { %v1145_v34 = vpack.c.bf16 %v1357_v32, %v1356_v30 }
 0x20f   :  { %v790_v63 = vpop.f32.mrf.mxu1 }
 0x210   :  { %1177 = vst [vmem:[%s1658_s4 + $0x58] sm:$0xff] %v1145_v34   ;;  %v1140_v6 = vpack.c.bf16 %v790_v63, %v787_v31 }
 0x211   :  { %v1360_v13 = vpop.f32.mrf.mxu1 }
 0x212   :  { %1176 = vst [vmem:[%s1658_s4 + $0x50] sm:$0xff] %v1140_v6  }
 0x213   :  { %v803_v20 = vpop.f32.mrf.mxu1 }
 0x215   :  { %v1361_v35 = vpop.f32.mrf.mxu1 }
 0x216   :  { %v1155_v36 = vpack.c.bf16 %v1361_v35, %v1360_v13 }
 0x217   :  { %v806_v37 = vpop.f32.mrf.mxu1 }
 0x218   :  { %1179 = vst [vmem:[%s1658_s4 + $0x68] sm:$0xff] %v1155_v36   ;;  %v1150_v38 = vpack.c.bf16 %v806_v37, %v803_v20 }
 0x219   :  { %v1364_v40 = vpop.f32.mrf.mxu1 }
 0x21a   :  { %1178 = vst [vmem:[%s1658_s4 + $0x60] sm:$0xff] %v1150_v38  }
 0x21b   :  { %v819_v41 = vpop.f32.mrf.mxu1 }
 0x21d   :  { %v1365_v42 = vpop.f32.mrf.mxu1 }
 0x21e   :  { %v1165_v43 = vpack.c.bf16 %v1365_v42, %v1364_v40 }
 0x21f   :  { %v822_v44 = vpop.f32.mrf.mxu1 }
 0x220   :  { %1181 = vst [vmem:[%s1658_s4 + $0x78] sm:$0xff] %v1165_v43   ;;  %v1160_v45 = vpack.c.bf16 %v822_v44, %v819_v41 }
 0x222   :  { %1180 = vst [vmem:[%s1658_s4 + $0x70] sm:$0xff] %v1160_v45  }

</bundles_post_ra>
